<compile_context>
chip_gen: v7x
topology: tpu7x:2x2x1
jax: 0.10.0
libtpu: 0.0.40
codegen_flags: <defaults>
</compile_context>

<pallas_src>
import functools

import jax
import jax.numpy as jnp
from jax import lax
from jax.experimental import pallas as pl
from jax.experimental.pallas import tpu as pltpu

LANE = 128  # lane width; classes are padded to this


# ----------------------------- Pallas kernel -------------------------------

def fused_forward_kernel(patches_ref, wc_ref, bc_ref, wl_ref, bl_ref, o_ref):
    """Conv(3x3, 'same') + bias + ReLU + Flatten + Linear, fully fused.

    patches_ref: (B*H*W, KH*KW*C) bf16  im2col patches of the input
    wc_ref:      (KH*KW*C, OC)    bf16  conv weight in im2col (kh,kw,c) order
    bc_ref:      (1, OC)          f32   conv bias
    wl_ref:      (H*W, OC*DP)     bf16  linear weight; wl[p, c*DP + j] is the
                                        weight multiplying the conv activation
                                        at spatial p, channel c for class j
                                        (classes zero-padded to DP=128)
    bl_ref:      (1, DP)          f32   linear bias (padded)
    o_ref:       (B, DP)          f32   padded logits
    """
    HW = wl_ref.shape[0]
    OC = wc_ref.shape[1]
    DP = bl_ref.shape[1]
    B = o_ref.shape[0]

    # --- Conv2d: one deep (B*H*W, 36) x (36, OC) matmul, f32 accumulate -----
    acc = jnp.dot(patches_ref[...], wc_ref[...],
                  preferred_element_type=jnp.float32)          # (B*HW, OC)
    act = jnp.maximum(acc + bc_ref[...], 0.0)                  # bias+ReLU, f32
    act16 = act.astype(jnp.bfloat16)                           # MXU operand

    # --- Flatten + Linear ---------------------------------------------------
    # Contract the spatial axis on the MXU from the native (HW, OC) layout:
    #   v[c, c'*DP + j] = sum_p act[b, p, c] * lin_w[c'*HW + p, j]
    # then sum the c == c' diagonal blocks (128-aligned lane slices).
    wl = wl_ref[...]
    bl = bl_ref[...]
    rows = []
    for b in range(B):                                         # static, tiny B
        a_b = act16[b * HW:(b + 1) * HW, :]                    # (HW, OC)
        v = lax.dot_general(a_b, wl, (((0,), (0,)), ((), ())),  # contract p
                            preferred_element_type=jnp.float32)  # (OC, OC*DP)
        out_b = bl
        for c in range(OC):
            out_b = out_b + v[c:c + 1, c * DP:(c + 1) * DP]    # (1, DP)
        rows.append(out_b)
    o_ref[...] = jnp.concatenate(rows, axis=0).astype(o_ref.dtype)


# ------------------------------- wrappers -----------------------------------

def prepare_params(params):
    """One-time (init-time) weight prep: layouts, flatten permutation, padding,
    bf16 casts.  Nothing here runs in the per-call forward path."""
    conv_w = params["conv_w"]      # (OC, C, KH, KW)  PyTorch OIHW
    conv_b = params["conv_b"]      # (OC,)
    lin_w = params["lin_w"]        # (OC*H*W, NUM_CLASSES), rows in C*H*W order
    lin_b = params["lin_b"]        # (NUM_CLASSES,)

    OC, C, KH, KW = conv_w.shape
    assert KH % 2 == 1 and KW % 2 == 1, "'same' padding needs odd kernel sizes"
    Din, Dout = lin_w.shape
    HW = Din // OC
    DP = LANE

    # conv: OIHW -> (KH*KW*C, OC), matching the im2col tap order (kh, kw, c).
    wc = jnp.transpose(conv_w, (2, 3, 1, 0)).reshape(KH * KW * C, OC)

    # linear: fold PyTorch's C*H*W flatten into the weight.  Row i = c*HW + p
    # of lin_w becomes wl[p, c*DP + j]; classes zero-padded to DP columns.
    wl = jnp.transpose(lin_w.reshape(OC, HW, Dout), (1, 0, 2))   # (HW, OC, Dout)
    wl = jnp.pad(wl, ((0, 0), (0, 0), (0, DP - Dout))).reshape(HW, OC * DP)

    return {
        "wc": wc.astype(jnp.bfloat16),
        "bc": conv_b.reshape(1, OC).astype(jnp.float32),
        "wl": wl.astype(jnp.bfloat16),
        "bl": jnp.pad(lin_b, (0, DP - Dout)).reshape(1, DP).astype(jnp.float32),
    }


def _im2col(x, KH, KW):
    """(B, C, H, W) -> (B*H*W, KH*KW*C) bf16 patches ('same' zero padding).

    Input-side prep done by XLA inside the jitted forward (fuses into a single
    small gather); keeps unaligned sub-tile slices/concats out of the kernel.
    """
    B, C, H, W = x.shape
    ph, pw = KH // 2, KW // 2
    xh = jnp.transpose(x, (0, 2, 3, 1))                          # NHWC
    xp = jnp.pad(xh, ((0, 0), (ph, ph), (pw, pw), (0, 0)))
    taps = [xp[:, kh:kh + H, kw:kw + W, :]
            for kh in range(KH) for kw in range(KW)]             # (kh, kw) order
    patches = jnp.concatenate(taps, axis=-1)                     # (B,H,W,KH*KW*C)
    return patches.reshape(B * H * W, KH * KW * C).astype(jnp.bfloat16)


@functools.partial(jax.jit, static_argnames=("num_classes",))
def model_tmax_forward(x, prep, *, num_classes):
    """Sequential forward: Conv2d(3x3, pad=1) -> ReLU -> Flatten -> Linear."""
    B, C = x.shape[0], x.shape[1]
    KC, _ = prep["wc"].shape
    DP = prep["bl"].shape[1]
    K = int(round((KC // C) ** 0.5))                             # square kernel

    patches = _im2col(x, K, K)

    out_pad = pl.pallas_call(
        fused_forward_kernel,
        out_shape=jax.ShapeDtypeStruct((B, DP), jnp.float32),
        in_specs=[
            pl.BlockSpec(memory_space=pltpu.MemorySpace.VMEM),   # patches
            pl.BlockSpec(memory_space=pltpu.MemorySpace.VMEM),   # conv weight
            pl.BlockSpec(memory_space=pltpu.MemorySpace.VMEM),   # conv bias
            pl.BlockSpec(memory_space=pltpu.MemorySpace.VMEM),   # linear weight
            pl.BlockSpec(memory_space=pltpu.MemorySpace.VMEM),   # linear bias
        ],
        out_specs=pl.BlockSpec(memory_space=pltpu.MemorySpace.VMEM),
    )(patches, prep["wc"], prep["bc"], prep["wl"], prep["bl"])

    return out_pad[:, :num_classes]


# TODO(synk): train_step / test_step (Adam optimizer, CrossEntropyLoss, the
# dynamic t_min/t_max bookkeeping on layers) are host-side training logic with
# no kernel content; only forward() is translated.


if __name__ == "__main__":
    B, C, H, W = 2, 4, 16, 16
    OC, K = 8, 3
    NUM_CLASSES = 10

    key = jax.random.PRNGKey(0)
    k1, k2, k3, k4, kx = jax.random.split(key, 5)
    params = {
        "conv_w": jax.random.normal(k1, (OC, C, K, K), jnp.float32) * 0.05,
        "conv_b": jax.random.normal(k2, (OC,), jnp.float32) * 0.05,
        "lin_w": jax.random.normal(k3, (OC * H * W, NUM_CLASSES), jnp.float32) * 0.05,
        "lin_b": jax.random.normal(k4, (NUM_CLASSES,), jnp.float32) * 0.05,
    }
    prep = prepare_params(params)        # one-time weight prep (init time)
    x = jax.random.normal(kx, (B, C, H, W), jnp.float32)

    y = model_tmax_forward(x, prep, num_classes=NUM_CLASSES)
    y = jax.block_until_ready(y)
    assert y.shape == (B, NUM_CLASSES) and y.dtype == jnp.float32
    print("KERNEL_OK")
</pallas_src>

<mosaic_0001>
module attributes {stable_mosaic.version = 11 : i64} {
  func.func @fused_forward_kernel(%arg0: memref<512x36xbf16, #tpu.memory_space<vmem>>, %arg1: memref<36x8xbf16, #tpu.memory_space<vmem>>, %arg2: memref<1x8xf32, #tpu.memory_space<vmem>>, %arg3: memref<256x1024xbf16, #tpu.memory_space<vmem>>, %arg4: memref<1x128xf32, #tpu.memory_space<vmem>>, %arg5: memref<2x128xf32, #tpu.memory_space<vmem>>) attributes {dimension_semantics = [], scalar_prefetch = 0 : i64, scratch_operands = 0 : i64, tpu.core_type = #tpu.core_type<tc>} {
    %c0 = arith.constant 0 : index
    %c0_0 = arith.constant 0 : index
    %0 = vector.load %arg0[%c0, %c0_0] : memref<512x36xbf16, #tpu.memory_space<vmem>>, vector<512x36xbf16>
    %c0_1 = arith.constant 0 : index
    %c0_2 = arith.constant 0 : index
    %1 = vector.load %arg1[%c0_1, %c0_2] : memref<36x8xbf16, #tpu.memory_space<vmem>>, vector<36x8xbf16>
    %cst = arith.constant dense<0.000000e+00> : vector<512x8xf32>
    %2 = tpu.matmul %0, %1, %cst {dimension_numbers = #tpu.dot_dimension_numbers<[1], [0], [0], [1], [0, 0, 1, 1], [], []>} : vector<512x36xbf16>, vector<36x8xbf16>, vector<512x8xf32> -> vector<512x8xf32>
    %c0_3 = arith.constant 0 : index
    %c0_4 = arith.constant 0 : index
    %3 = vector.load %arg2[%c0_3, %c0_4] : memref<1x8xf32, #tpu.memory_space<vmem>>, vector<1x8xf32>
    %4 = vector.broadcast %3 : vector<1x8xf32> to vector<512x8xf32>
    %5 = arith.addf %2, %4 : vector<512x8xf32>
    %cst_5 = arith.constant 0.000000e+00 : f32
    %6 = vector.broadcast %cst_5 : f32 to vector<512x8xf32>
    %7 = arith.maximumf %5, %6 : vector<512x8xf32>
    %8 = arith.truncf %7 : vector<512x8xf32> to vector<512x8xbf16>
    %c0_6 = arith.constant 0 : index
    %c0_7 = arith.constant 0 : index
    %9 = vector.load %arg3[%c0_6, %c0_7] : memref<256x1024xbf16, #tpu.memory_space<vmem>>, vector<256x1024xbf16>
    %c0_8 = arith.constant 0 : index
    %c0_9 = arith.constant 0 : index
    %10 = vector.load %arg4[%c0_8, %c0_9] : memref<1x128xf32, #tpu.memory_space<vmem>>, vector<1x128xf32>
    %11 = vector.extract_strided_slice %8 {offsets = [0, 0], sizes = [256, 8], strides = [1, 1]} : vector<512x8xbf16> to vector<256x8xbf16>
    %cst_10 = arith.constant dense<0.000000e+00> : vector<8x1024xf32>
    %12 = tpu.matmul %11, %9, %cst_10 {dimension_numbers = #tpu.dot_dimension_numbers<[0], [0], [1], [1], [0, 1, 1, 1], [], []>} : vector<256x8xbf16>, vector<256x1024xbf16>, vector<8x1024xf32> -> vector<8x1024xf32>
    %13 = vector.extract_strided_slice %12 {offsets = [0, 0], sizes = [1, 128], strides = [1, 1]} : vector<8x1024xf32> to vector<1x128xf32>
    %14 = arith.addf %10, %13 : vector<1x128xf32>
    %15 = vector.extract_strided_slice %12 {offsets = [1, 128], sizes = [1, 128], strides = [1, 1]} : vector<8x1024xf32> to vector<1x128xf32>
    %16 = arith.addf %14, %15 : vector<1x128xf32>
    %17 = vector.extract_strided_slice %12 {offsets = [2, 256], sizes = [1, 128], strides = [1, 1]} : vector<8x1024xf32> to vector<1x128xf32>
    %18 = arith.addf %16, %17 : vector<1x128xf32>
    %19 = vector.extract_strided_slice %12 {offsets = [3, 384], sizes = [1, 128], strides = [1, 1]} : vector<8x1024xf32> to vector<1x128xf32>
    %20 = arith.addf %18, %19 : vector<1x128xf32>
    %21 = vector.extract_strided_slice %12 {offsets = [4, 512], sizes = [1, 128], strides = [1, 1]} : vector<8x1024xf32> to vector<1x128xf32>
    %22 = arith.addf %20, %21 : vector<1x128xf32>
    %23 = vector.extract_strided_slice %12 {offsets = [5, 640], sizes = [1, 128], strides = [1, 1]} : vector<8x1024xf32> to vector<1x128xf32>
    %24 = arith.addf %22, %23 : vector<1x128xf32>
    %25 = vector.extract_strided_slice %12 {offsets = [6, 768], sizes = [1, 128], strides = [1, 1]} : vector<8x1024xf32> to vector<1x128xf32>
    %26 = arith.addf %24, %25 : vector<1x128xf32>
    %27 = vector.extract_strided_slice %12 {offsets = [7, 896], sizes = [1, 128], strides = [1, 1]} : vector<8x1024xf32> to vector<1x128xf32>
    %28 = arith.addf %26, %27 : vector<1x128xf32>
    %29 = vector.extract_strided_slice %8 {offsets = [256, 0], sizes = [256, 8], strides = [1, 1]} : vector<512x8xbf16> to vector<256x8xbf16>
    %cst_11 = arith.constant dense<0.000000e+00> : vector<8x1024xf32>
    %30 = tpu.matmul %29, %9, %cst_11 {dimension_numbers = #tpu.dot_dimension_numbers<[0], [0], [1], [1], [0, 1, 1, 1], [], []>} : vector<256x8xbf16>, vector<256x1024xbf16>, vector<8x1024xf32> -> vector<8x1024xf32>
    %31 = vector.extract_strided_slice %30 {offsets = [0, 0], sizes = [1, 128], strides = [1, 1]} : vector<8x1024xf32> to vector<1x128xf32>
    %32 = arith.addf %10, %31 : vector<1x128xf32>
    %33 = vector.extract_strided_slice %30 {offsets = [1, 128], sizes = [1, 128], strides = [1, 1]} : vector<8x1024xf32> to vector<1x128xf32>
    %34 = arith.addf %32, %33 : vector<1x128xf32>
    %35 = vector.extract_strided_slice %30 {offsets = [2, 256], sizes = [1, 128], strides = [1, 1]} : vector<8x1024xf32> to vector<1x128xf32>
    %36 = arith.addf %34, %35 : vector<1x128xf32>
    %37 = vector.extract_strided_slice %30 {offsets = [3, 384], sizes = [1, 128], strides = [1, 1]} : vector<8x1024xf32> to vector<1x128xf32>
    %38 = arith.addf %36, %37 : vector<1x128xf32>
    %39 = vector.extract_strided_slice %30 {offsets = [4, 512], sizes = [1, 128], strides = [1, 1]} : vector<8x1024xf32> to vector<1x128xf32>
    %40 = arith.addf %38, %39 : vector<1x128xf32>
    %41 = vector.extract_strided_slice %30 {offsets = [5, 640], sizes = [1, 128], strides = [1, 1]} : vector<8x1024xf32> to vector<1x128xf32>
    %42 = arith.addf %40, %41 : vector<1x128xf32>
    %43 = vector.extract_strided_slice %30 {offsets = [6, 768], sizes = [1, 128], strides = [1, 1]} : vector<8x1024xf32> to vector<1x128xf32>
    %44 = arith.addf %42, %43 : vector<1x128xf32>
    %45 = vector.extract_strided_slice %30 {offsets = [7, 896], sizes = [1, 128], strides = [1, 1]} : vector<8x1024xf32> to vector<1x128xf32>
    %46 = arith.addf %44, %45 : vector<1x128xf32>
    %47 = tpu.concatenate %28, %46 in 0 : vector<1x128xf32>, vector<1x128xf32> -> vector<2x128xf32>
    %c0_12 = arith.constant 0 : index
    %c0_13 = arith.constant 0 : index
    %48 = vector.load %arg5[%c0_12, %c0_13] : memref<2x128xf32, #tpu.memory_space<vmem>>, vector<2x128xf32>
    tpu.vector_store %arg5[%c0_12, %c0_13], %47 {strides = array<i32>} : memref<2x128xf32, #tpu.memory_space<vmem>>, vector<2x128xf32>,
    return
  }
}

</mosaic_0001>

<bundles_post_ra>
// kernel: model_tmax_forward.1
= control target key start
LH: loop header
LB: loop body
LE: loop exit
PB: predicated region body
PF: predicated region fallthrough
CT: control target
= control target key end

     0   :  { %vm273_vm0 = vcmask 293888   ;;  %vm370_vm1 = vcmask 1041408   ;;  %s3777_s0 = inlined_call_operand.vmem [shape: bf16[512,36], index: 0, kind: input, shape index: {}]   ;;  %s3778_s1 = inlined_call_operand.vmem [shape: bf16[36,8], index: 1, kind: input, shape index: {}]   ;;  %s3779_s2 = inlined_call_operand.vmem [shape: f32[1,8], index: 2, kind: input, shape index: {}]   ;;  %s3780_s3 = inlined_call_operand.vmem [shape: bf16[256,1024], index: 3, kind: input, shape index: {}]   ;;  %s3781_s4 = inlined_call_operand.vmem [shape: f32[1,128], index: 4, kind: input, shape index: {}]   ;;  %s3782_s5 = inlined_call_operand.hbm [shape: f32[2,128], index: 5, kind: output, shape index: {}]  }
   0x1   :  { %v2511_v0 = vld [vmem:[%s3778_s1] sm:$0xff]   ;;  %v2512_v1 = vld [vmem:[%s3778_s1 + $0x8] sm:$0xff]   ;;  %v2513_v2 = vld [vmem:[%s3778_s1 + $0x10] ss:$0 sps:$4 sm:$0x33]  }
   0x2   :  { %2438 = vmatprep.subr.bf16.mxu0 %v2511_v0  ;;  %v2514_v3 = vld [vmem:[%s3777_s0] sm:$0xff]   ;;  %v372_v4 = vsel %vm370_vm1, %v2513_v2, 0  ;;  %v2515_v5 = vld [vmem:[%s3777_s0 + $0x8] sm:$0xff]   ;;  %v2516_v6 = vld [vmem:[%s3777_s0 + $0x10] sm:$0xff]  }
   0x3   :  { %2439 = vmatpush3.bf16.msra.mxu0 %v2511_v0  ;;  %2444 = vmatprep.mubr.msk.bf16.mxu0 %vm273_vm0, %v2514_v3  ;;  %v2517_v7 = vld [vmem:[%s3777_s0 + $0x18] sm:$0xff]   ;;  %v2518_v8 = vld [vmem:[%s3777_s0 + $0x20] sm:$0xff]   ;;  %v2519_v9 = vld [vmem:[%s3777_s0 + $0x28] sm:$0xff]  }
   0x4   :  { %2440 = vmatprep.subr.bf16.mxu0 %v2512_v1  ;;  %v2520_v10 = vld [vmem:[%s3777_s0 + $0x30] sm:$0xff]   ;;  %v2521_v11 = vld [vmem:[%s3777_s0 + $0x38] sm:$0xff]  }
   0x7   :  { %2441 = vmatpush3.bf16.msra.mxu0 %v2512_v1 }
   0x8   :  { %2508 = vmatprep.subr.msk.bf16.mxu0 %vm370_vm1, %v2513_v2 }
   0xb   :  { %2443 = vmatpush3.bf16.msra.mxu0 %v372_v4 }
   0xe   :  { %2445 = vmatmul.mubr.msk.bf16.vlgmr.msra.gmra.mrb[0].mxu0 %vm273_vm0, %v2515_v5 }
   0xf   :  { %2448 = vmatprep.mubr.msk.bf16.mxu0 %vm273_vm0, %v2516_v6 }
  0x16   :  { %2449 = vmatmul.mubr.msk.bf16.gmra.mrb[4].mxu0 %vm273_vm0, %v2517_v7 }
  0x17   :  { %2452 = vmatprep.mubr.msk.bf16.mxu0 %vm273_vm0, %v2518_v8 }
  0x1e   :  { %2453 = vmatmul.mubr.msk.bf16.gmra.mrb[8].mxu0 %vm273_vm0, %v2519_v9 }
  0x1f   :  { %2456 = vmatprep.mubr.msk.bf16.mxu0 %vm273_vm0, %v2520_v10 }
  0x20   :  { %10 = vsyncpa [#allocation3], 0  ;;  %v2522_v12 = vld [vmem:[%s3777_s0 + $0x40] sm:$0xff]   ;;  %v2523_v13 = vld [vmem:[%s3777_s0 + $0x48] sm:$0xff]   ;;  %vm2190_vm2 = vcmask 1040384  }
  0x21   :  { %v2524_v14 = vld [vmem:[%s3777_s0 + $0x50] sm:$0xff]   ;;  %v2525_v15 = vld [vmem:[%s3777_s0 + $0x58] sm:$0xff]   ;;  %v2526_v16 = vld [vmem:[%s3777_s0 + $0x60] sm:$0xff]  }
  0x22   :  { %v2527_v17 = vld [vmem:[%s3777_s0 + $0x68] sm:$0xff]   ;;  %v2528_v18 = vld [vmem:[%s3777_s0 + $0x70] sm:$0xff]   ;;  %v2529_v19 = vld [vmem:[%s3777_s0 + $0x78] sm:$0xff]  }
  0x23   :  { %v2530_v20 = vld [vmem:[%s3777_s0 + $0x80] sm:$0xff]   ;;  %v2531_v21 = vld [vmem:[%s3777_s0 + $0x88] sm:$0xff]   ;;  %v2532_v22 = vld [vmem:[%s3777_s0 + $0x90] sm:$0xff]  }
  0x24   :  { %v2533_v23 = vld [vmem:[%s3777_s0 + $0x98] sm:$0xff]   ;;  %v2534_v24 = vld [vmem:[%s3777_s0 + $0xa0] sm:$0xff]   ;;  %v2535_v25 = vld [vmem:[%s3777_s0 + $0xa8] sm:$0xff]  }
  0x25   :  { %v2536_v26 = vld [vmem:[%s3777_s0 + $0xb0] sm:$0xff]   ;;  %v2537_v27 = vld [vmem:[%s3777_s0 + $0xb8] sm:$0xff]   ;;  %v2538_v28 = vld [vmem:[%s3777_s0 + $0xc0] sm:$0xff]  }
  0x26   :  { %2457 = vmatmul.mubr.msk.bf16.gmra.mrb[12].mxu0 %vm273_vm0, %v2521_v11  ;;  %v2539_v29 = vld [vmem:[%s3777_s0 + $0xc8] sm:$0xff]   ;;  %v2540_v30 = vld [vmem:[%s3777_s0 + $0xd0] sm:$0xff]   ;;  %v2541_v31 = vld [vmem:[%s3777_s0 + $0xd8] sm:$0xff]  }
  0x27   :  { %2460 = vmatprep.mubr.msk.bf16.mxu0 %vm273_vm0, %v2522_v12  ;;  %v2542_v32 = vld [vmem:[%s3777_s0 + $0xe0] sm:$0xff]   ;;  %v2543_v33 = vld [vmem:[%s3777_s0 + $0xe8] sm:$0xff]   ;;  %v2544_v34 = vld [vmem:[%s3777_s0 + $0xf0] sm:$0xff]  }
  0x28   :  { %v2545_v35 = vld [vmem:[%s3777_s0 + $0xf8] sm:$0xff]   ;;  %v759_v36 = vld [vmem:[%s3780_s3] sm:$0xff]  ;;  %v761_v38 = vld [vmem:[%s3780_s3 + $0x10] sm:$0xff] }
  0x29   :  { %v763_v37 = vld [vmem:[%s3780_s3 + $0x20] sm:$0xff]  ;;  %v765_v41 = vld [vmem:[%s3780_s3 + $0x30] sm:$0xff] }
  0x2a   :  { %v2748_v39 = vcombine.high %v759_v36, %v763_v37  ;;  %v2750_v40 = vcombine.low %v759_v36, %v763_v37  ;;  %v767_v42 = vld [vmem:[%s3780_s3 + $0x40] sm:$0xff]  ;;  %v2761_v44 = vcombine.low %v761_v38, %v765_v41  ;;  %v2763_v45 = vcombine.high %v761_v38, %v765_v41  ;;  %v769_v47 = vld [vmem:[%s3780_s3 + $0x50] sm:$0xff] }
  0x2b   :  { %v771_v43 = vld [vmem:[%s3780_s3 + $0x60] sm:$0xff]  ;;  %v773_v48 = vld [vmem:[%s3780_s3 + $0x70] sm:$0xff] }
  0x2c   :  { %v2765_v46 = vcombine.high %v767_v42, %v771_v43  ;;  %v775_v49 = vld [vmem:[%s3780_s3 + $0x80] sm:$0xff]  ;;  %1560 = vmatprep.subr.bf16.mxu1 %v2748_v39  ;;  %v2777_v50 = vcombine.high %v769_v47, %v773_v48  ;;  %v777_v52 = vld [vmem:[%s3780_s3 + $0x90] sm:$0xff]  ;;  %1642 = vmatprep.subr.bf16.mxu0 %v2763_v45  ;;  %v2790_v54 = vcombine.low %v767_v42, %v771_v43 }
  0x2d   :  { %v779_v51 = vld [vmem:[%s3780_s3 + $0xa0] sm:$0xff]  ;;  %v781_v53 = vld [vmem:[%s3780_s3 + $0xb0] sm:$0xff]  ;;  %1561 = vmatpush1.bf16.msra.mxu1 %v2750_v40  ;;  %1643 = vmatpush1.bf16.msra.mxu0 %v2761_v44  ;;  %v2794_v55 = vcombine.low %v769_v47, %v773_v48 }
  0x2e   :  { %2461 = vmatmul.mubr.msk.bf16.gmra.mrb[16].mxu0 %vm273_vm0, %v2523_v13  ;;  %1562 = vmatprep.subr.bf16.mxu1 %v2765_v46  ;;  %v2796_v56 = vcombine.high %v775_v49, %v779_v51  ;;  %v2799_v57 = vcombine.high %v777_v52, %v781_v53  ;;  %v783_v58 = vld [vmem:[%s3780_s3 + $0xc0] sm:$0xff]  ;;  %v785_v60 = vld [vmem:[%s3780_s3 + $0xd0] sm:$0xff]  ;;  %v2814_v62 = vcombine.low %v775_v49, %v779_v51 }
  0x2f   :  { %2464 = vmatprep.mubr.msk.bf16.mxu0 %vm273_vm0, %v2524_v14  ;;  %1644 = vmatprep.subr.bf16.mxu0 %v2777_v50  ;;  %v787_v59 = vld [vmem:[%s3780_s3 + $0xe0] sm:$0xff]  ;;  %v789_v61 = vld [vmem:[%s3780_s3 + $0xf0] sm:$0xff]  ;;  %v2818_v63 = vcombine.low %v777_v52, %v781_v53 }
  0x30   :  { %v2820_v0 = vcombine.high %v783_v58, %v787_v59  ;;  %v2823_v1 = vcombine.high %v785_v60, %v789_v61  ;;  %v791_v2 = vld [vmem:[%s3780_s3 + $0x100] sm:$0xff]  ;;  %v793_v4 = vld [vmem:[%s3780_s3 + $0x110] sm:$0xff]  ;;  %v2838_v6 = vcombine.low %v783_v58, %v787_v59  ;;  %v2842_v7 = vcombine.low %v785_v60, %v789_v61 }
  0x31   :  { %1563 = vmatpush1.bf16.msra.mxu1 %v2790_v54  ;;  %1645 = vmatpush1.bf16.msra.mxu0 %v2794_v55  ;;  %v795_v3 = vld [vmem:[%s3780_s3 + $0x120] sm:$0xff]  ;;  %v797_v5 = vld [vmem:[%s3780_s3 + $0x130] sm:$0xff] }
  0x32   :  { %1564 = vmatprep.subr.bf16.mxu1 %v2796_v56  ;;  %1646 = vmatprep.subr.bf16.mxu0 %v2799_v57  ;;  %v2844_v8 = vcombine.high %v791_v2, %v795_v3  ;;  %v2847_v9 = vcombine.high %v793_v4, %v797_v5  ;;  %v799_v10 = vld [vmem:[%s3780_s3 + $0x140] sm:$0xff]  ;;  %v801_v12 = vld [vmem:[%s3780_s3 + $0x150] sm:$0xff]  ;;  %v2862_v14 = vcombine.low %v791_v2, %v795_v3 }
  0x33   :  { %v803_v11 = vld [vmem:[%s3780_s3 + $0x160] sm:$0xff]  ;;  %v805_v13 = vld [vmem:[%s3780_s3 + $0x170] sm:$0xff] }
  0x34   :  { %v825_v36 = vld [vmem:[%s3780_s3 + $0x210] sm:$0xff]  ;;  %v831_v47 = vld [vmem:[%s3780_s3 + $0x240] sm:$0xff] }
  0x35   :  { %1565 = vmatpush1.bf16.msra.mxu1 %v2814_v62  ;;  %1647 = vmatpush1.bf16.msra.mxu0 %v2818_v63  ;;  %v829_v37 = vld [vmem:[%s3780_s3 + $0x230] sm:$0xff]  ;;  %v835_v48 = vld [vmem:[%s3780_s3 + $0x260] sm:$0xff] }
  0x36   :  { %2465 = vmatmul.mubr.msk.bf16.gmra.mrb[20].mxu0 %vm273_vm0, %v2525_v15  ;;  %1566 = vmatprep.subr.bf16.mxu1 %v2820_v0  ;;  %v2866_v15 = vcombine.low %v793_v4, %v797_v5  ;;  %v2943_v43 = vcombine.high %v825_v36, %v829_v37  ;;  %v833_v49 = vld [vmem:[%s3780_s3 + $0x250] sm:$0xff]  ;;  %v2962_v53 = vcombine.low %v825_v36, %v829_v37  ;;  %v839_v60 = vld [vmem:[%s3780_s3 + $0x280] sm:$0xff] }
  0x37   :  { %2468 = vmatprep.mubr.msk.bf16.mxu0 %vm273_vm0, %v2526_v16  ;;  %1648 = vmatprep.subr.bf16.mxu0 %v2823_v1  ;;  %v2868_v16 = vcombine.high %v799_v10, %v803_v11  ;;  %v837_v51 = vld [vmem:[%s3780_s3 + $0x270] sm:$0xff]  ;;  %v2964_v58 = vcombine.high %v831_v47, %v835_v48  ;;  %v843_v61 = vld [vmem:[%s3780_s3 + $0x2a0] sm:$0xff]  ;;  %v2982_v4 = vcombine.low %v831_v47, %v835_v48 }
  0x38   :  { %3820 = vst [vmem:[#allocation10_spill] sm:$0xff] %v2943_v43  ;;  %3821 = vst [vmem:[#allocation11_spill] sm:$0xff] %v2962_v53  ;;  %v2967_v59 = vcombine.high %v833_v49, %v837_v51  ;;  %v841_v2 = vld [vmem:[%s3780_s3 + $0x290] sm:$0xff]  ;;  %v2986_v5 = vcombine.low %v833_v49, %v837_v51  ;;  %v863_v49 = vld [vmem:[%s3780_s3 + $0x340] sm:$0xff] }
  0x39   :  { %1567 = vmatpush1.bf16.msra.mxu1 %v2838_v6  ;;  %1649 = vmatpush1.bf16.msra.mxu0 %v2842_v7  ;;  %v845_v3 = vld [vmem:[%s3780_s3 + $0x2b0] sm:$0xff]  ;;  %v867_v51 = vld [vmem:[%s3780_s3 + $0x360] sm:$0xff] }
  0x3a   :  { %1568 = vmatprep.subr.bf16.mxu1 %v2844_v8  ;;  %1650 = vmatprep.subr.bf16.mxu0 %v2847_v9  ;;  %3822 = vst [vmem:[#allocation12_spill] sm:$0xff] %v2967_v59  ;;  %3823 = vst [vmem:[#allocation13_spill] sm:$0xff] %v2986_v5 }
  0x3d   :  { %1569 = vmatpush1.bf16.msra.mxu1 %v2862_v14  ;;  %1651 = vmatpush1.bf16.msra.mxu0 %v2866_v15 }
  0x3e   :  { %2469 = vmatmul.mubr.msk.bf16.gmra.mrb[24].mxu0 %vm273_vm0, %v2527_v17  ;;  %v2871_v17 = vcombine.high %v801_v12, %v805_v13  ;;  %1570 = vmatprep.subr.bf16.mxu1 %v2868_v16 }
  0x3f   :  { %2472 = vmatprep.mubr.msk.bf16.mxu0 %vm273_vm0, %v2528_v18  ;;  %v807_v18 = vld [vmem:[%s3780_s3 + $0x180] sm:$0xff] }
  0x40   :  { %1652 = vmatprep.subr.bf16.mxu0 %v2871_v17 }
  0x46   :  { %2473 = vmatmul.mubr.msk.bf16.gmra.mrb[28].mxu0 %vm273_vm0, %v2529_v19  ;;  %v811_v19 = vld [vmem:[%s3780_s3 + $0x1a0] sm:$0xff] }
  0x47   :  { %2476 = vmatprep.mubr.msk.bf16.mxu0 %vm273_vm0, %v2530_v20  ;;  %v809_v20 = vld [vmem:[%s3780_s3 + $0x190] sm:$0xff] }
  0x4e   :  { %2477 = vmatmul.mubr.msk.bf16.gmra.mrb[32].mxu0 %vm273_vm0, %v2531_v21  ;;  %v813_v21 = vld [vmem:[%s3780_s3 + $0x1b0] sm:$0xff] }
  0x4f   :  { %2480 = vmatprep.mubr.msk.bf16.mxu0 %vm273_vm0, %v2532_v22  ;;  %v2886_v22 = vcombine.low %v799_v10, %v803_v11  ;;  %v2988_v10 = vcombine.high %v839_v60, %v843_v61  ;;  %v2991_v11 = vcombine.high %v841_v2, %v845_v3 }
  0x51   :  { %1571 = vmatpush1.bf16.msra.mxu1 %v2886_v22  ;;  %3824 = vst [vmem:[#allocation14_spill] sm:$0xff] %v2991_v11 }
  0x56   :  { %2481 = vmatmul.mubr.msk.bf16.gmra.mrb[36].mxu0 %vm273_vm0, %v2533_v23  ;;  %v2890_v23 = vcombine.low %v801_v12, %v805_v13  ;;  %v847_v12 = vld [vmem:[%s3780_s3 + $0x2c0] sm:$0xff] }
  0x57   :  { %2484 = vmatprep.mubr.msk.bf16.mxu0 %vm273_vm0, %v2534_v24  ;;  %v2892_v24 = vcombine.high %v807_v18, %v811_v19  ;;  %v851_v13 = vld [vmem:[%s3780_s3 + $0x2e0] sm:$0xff] }
  0x58   :  { %3815 = vst [vmem:[#allocation5_spill] sm:$0xff] %v2890_v23  ;;  %1653 = vmatpush1.bf16.msra.mxu0 %v2890_v23  ;;  %v3030_v36 = vcombine.low %v847_v12, %v851_v13 }
  0x59   :  { %1572 = vmatprep.subr.bf16.mxu1 %v2892_v24 }
  0x5e   :  { %2485 = vmatmul.mubr.msk.bf16.gmra.mrb[40].mxu0 %vm273_vm0, %v2535_v25  ;;  %v2895_v25 = vcombine.high %v809_v20, %v813_v21 }
  0x5f   :  { %2488 = vmatprep.mubr.msk.bf16.mxu0 %vm273_vm0, %v2536_v26  ;;  %v815_v26 = vld [vmem:[%s3780_s3 + $0x1c0] sm:$0xff] }
  0x60   :  { %3816 = vst [vmem:[#allocation6_spill] sm:$0xff] %v2895_v25  ;;  %1654 = vmatprep.subr.bf16.mxu0 %v2895_v25 }
  0x66   :  { %2489 = vmatmul.mubr.msk.bf16.gmra.mrb[44].mxu0 %vm273_vm0, %v2537_v27  ;;  %v819_v27 = vld [vmem:[%s3780_s3 + $0x1e0] sm:$0xff] }
  0x67   :  { %2492 = vmatprep.mubr.msk.bf16.mxu0 %vm273_vm0, %v2538_v28  ;;  %v817_v28 = vld [vmem:[%s3780_s3 + $0x1d0] sm:$0xff]  ;;  %v2934_v38 = vcombine.low %v815_v26, %v819_v27 }
  0x6e   :  { %2493 = vmatmul.mubr.msk.bf16.gmra.mrb[48].mxu0 %vm273_vm0, %v2539_v29  ;;  %v821_v29 = vld [vmem:[%s3780_s3 + $0x1f0] sm:$0xff] }
  0x6f   :  { %2496 = vmatprep.mubr.msk.bf16.mxu0 %vm273_vm0, %v2540_v30  ;;  %v2910_v30 = vcombine.low %v807_v18, %v811_v19  ;;  %v2938_v41 = vcombine.low %v817_v28, %v821_v29  ;;  %v849_v18 = vld [vmem:[%s3780_s3 + $0x2d0] sm:$0xff] }
  0x70   :  { %v853_v19 = vld [vmem:[%s3780_s3 + $0x2f0] sm:$0xff] }
  0x71   :  { %1573 = vmatpush1.bf16.msra.mxu1 %v2910_v30  ;;  %3819 = vst [vmem:[#allocation9_spill] sm:$0xff] %v2938_v41  ;;  %v3034_v37 = vcombine.low %v849_v18, %v853_v19 }
  0x73   :  { %3827 = vst [vmem:[#allocation17_spill] sm:$0xff] %v3034_v37 }
  0x76   :  { %2497 = vmatmul.mubr.msk.bf16.gmra.mrb[52].mxu0 %vm273_vm0, %v2541_v31  ;;  %v2914_v31 = vcombine.low %v809_v20, %v813_v21  ;;  %v3006_v20 = vcombine.low %v839_v60, %v843_v61  ;;  %v3010_v21 = vcombine.low %v841_v2, %v845_v3  ;;  %v865_v60 = vld [vmem:[%s3780_s3 + $0x350] sm:$0xff] }
  0x77   :  { %2500 = vmatprep.mubr.msk.bf16.mxu0 %vm273_vm0, %v2542_v32  ;;  %v2916_v32 = vcombine.high %v815_v26, %v819_v27  ;;  %v3012_v26 = vcombine.high %v847_v12, %v851_v13  ;;  %v3015_v27 = vcombine.high %v849_v18, %v853_v19  ;;  %v869_v61 = vld [vmem:[%s3780_s3 + $0x370] sm:$0xff]  ;;  %v3060_v12 = vcombine.high %v863_v49, %v867_v51  ;;  %v871_v18 = vld [vmem:[%s3780_s3 + $0x380] sm:$0xff] }
  0x78   :  { %3817 = vst [vmem:[#allocation7_spill] sm:$0xff] %v2914_v31  ;;  %1655 = vmatpush1.bf16.msra.mxu0 %v2914_v31  ;;  %3825 = vst [vmem:[#allocation15_spill] sm:$0xff] %v3010_v21  ;;  %v3063_v13 = vcombine.high %v865_v60, %v869_v61  ;;  %v875_v19 = vld [vmem:[%s3780_s3 + $0x3a0] sm:$0xff] }
  0x79   :  { %1574 = vmatprep.subr.bf16.mxu1 %v2916_v32  ;;  %3826 = vst [vmem:[#allocation16_spill] sm:$0xff] %v3015_v27 }
  0x7a   :  { %1575 = vmatpush1.bf16.msra.mxu1 %v2934_v38  ;;  %3830 = vst [vmem:[#allocation20_spill] sm:$0xff] %v3063_v13 }
  0x7e   :  { %2501 = vmatmul.mubr.msk.bf16.gmra.mrb[56].mxu0 %vm273_vm0, %v2543_v33  ;;  %v2919_v33 = vcombine.high %v817_v28, %v821_v29  ;;  %v855_v28 = vld [vmem:[%s3780_s3 + $0x300] sm:$0xff] }
  0x7f   :  { %2504 = vmatprep.mubr.msk.bf16.mxu0 %vm273_vm0, %v2544_v34  ;;  %v823_v34 = vld [vmem:[%s3780_s3 + $0x200] sm:$0xff] }
  0x80   :  { %3818 = vst [vmem:[#allocation8_spill] sm:$0xff] %v2919_v33  ;;  %1656 = vmatprep.subr.bf16.mxu0 %v2919_v33  ;;  %v859_v29 = vld [vmem:[%s3780_s3 + $0x320] sm:$0xff] }
  0x81   :  { %1657 = vmatpush1.bf16.msra.mxu0 %v2938_v41  ;;  %v3036_v47 = vcombine.high %v855_v28, %v859_v29  ;;  %v3054_v2 = vcombine.low %v855_v28, %v859_v29  ;;  %v873_v28 = vld [vmem:[%s3780_s3 + $0x390] sm:$0xff] }
  0x82   :  { %1658 = vmatprep.subr.bf16.mxu0 %v2943_v43  ;;  %v877_v29 = vld [vmem:[%s3780_s3 + $0x3b0] sm:$0xff] }
  0x85   :  { %1659 = vmatpush1.bf16.msra.mxu0 %v2962_v53 }
  0x86   :  { %2505 = vmatmul.mubr.msk.bf16.gmra.mrb[60].mxu0 %vm273_vm0, %v2545_v35  ;;  %v827_v35 = vld [vmem:[%s3780_s3 + $0x220] sm:$0xff]  ;;  %1660 = vmatprep.subr.bf16.mxu0 %v2967_v59 }
  0x87   :  { %v2940_v42 = vcombine.high %v823_v34, %v827_v35  ;;  %v2958_v52 = vcombine.low %v823_v34, %v827_v35  ;;  %v857_v34 = vld [vmem:[%s3780_s3 + $0x310] sm:$0xff] }
  0x88   :  { %v861_v35 = vld [vmem:[%s3780_s3 + $0x330] sm:$0xff] }
  0x89   :  { %1576 = vmatprep.subr.bf16.mxu1 %v2940_v42  ;;  %1661 = vmatpush1.bf16.msra.mxu0 %v2986_v5  ;;  %v3039_v48 = vcombine.high %v857_v34, %v861_v35  ;;  %v3058_v3 = vcombine.low %v857_v34, %v861_v35  ;;  %v3078_v34 = vcombine.low %v863_v49, %v867_v51  ;;  %v883_v49 = vld [vmem:[%s3780_s3 + $0x3e0] sm:$0xff]  ;;  %v881_v51 = vld [vmem:[%s3780_s3 + $0x3d0] sm:$0xff] }
  0x8a   :  { %1577 = vmatpush1.bf16.msra.mxu1 %v2958_v52  ;;  %1662 = vmatprep.subr.bf16.mxu0 %v2991_v11  ;;  %v3082_v35 = vcombine.low %v865_v60, %v869_v61  ;;  %v885_v60 = vld [vmem:[%s3780_s3 + $0x3f0] sm:$0xff]  ;;  %v3104_v61 = vld [vmem:[%s3779_s2] ss:$0 sm:$0xff] }
  0x8b   :  { %1578 = vmatprep.subr.bf16.mxu1 %v2964_v58  ;;  %3828 = vst [vmem:[#allocation18_spill] sm:$0xff] %v3039_v48  ;;  %3829 = vst [vmem:[#allocation19_spill] sm:$0xff] %v3058_v3  ;;  %v3116_v5 = vcombine.high %v881_v51, %v885_v60 }
  0x8c   :  { %3831 = vst [vmem:[#allocation21_spill] sm:$0xff] %v3082_v35 }
  0x8d   :  { %1663 = vmatpush1.bf16.msra.mxu0 %v3010_v21  ;;  %3834 = vst [vmem:[#allocation24_spill] sm:$0xff] %v3116_v5 }
  0x8e   :  { %1579 = vmatpush1.bf16.msra.mxu1 %v2982_v4  ;;  %1664 = vmatprep.subr.bf16.mxu0 %v3015_v27  ;;  %v879_v27 = vld [vmem:[%s3780_s3 + $0x3c0] sm:$0xff] }
  0x8f   :  { %1580 = vmatprep.subr.bf16.mxu1 %v2988_v10  ;;  %v3113_v21 = vcombine.high %v879_v27, %v883_v49 }
  0x91   :  { %1665 = vmatpush1.bf16.msra.mxu0 %v3034_v37  ;;  %v3087_v37 = vcombine.high %v873_v28, %v877_v29 }
  0x92   :  { %1581 = vmatpush1.bf16.msra.mxu1 %v3006_v20  ;;  %1666 = vmatprep.subr.bf16.mxu0 %v3039_v48  ;;  %v3084_v48 = vcombine.high %v871_v18, %v875_v19 }
  0x93   :  { %1582 = vmatprep.subr.bf16.mxu1 %v3012_v26  ;;  %3832 = vst [vmem:[#allocation22_spill] sm:$0xff] %v3087_v37 }
  0x95   :  { %1667 = vmatpush1.bf16.msra.mxu0 %v3058_v3  ;;  %v3111_v3 = vcombine.low %v873_v28, %v877_v29 }
  0x96   :  { %1583 = vmatpush1.bf16.msra.mxu1 %v3030_v36  ;;  %1668 = vmatprep.subr.bf16.mxu0 %v3063_v13  ;;  %v3107_v13 = vcombine.low %v871_v18, %v875_v19  ;;  %v3121_v19 = vcombine.low %v879_v27, %v883_v49 }
  0x97   :  { %1584 = vmatprep.subr.bf16.mxu1 %v3036_v47  ;;  %3833 = vst [vmem:[#allocation23_spill] sm:$0xff] %v3111_v3 }
  0x99   :  { %1669 = vmatpush1.bf16.msra.mxu0 %v3082_v35 }
  0x9a   :  { %1585 = vmatpush1.bf16.msra.mxu1 %v3054_v2  ;;  %1670 = vmatprep.subr.bf16.mxu0 %v3087_v37  ;;  %v3126_v37 = vcombine.low %v881_v51, %v885_v60 }
  0x9b   :  { %1586 = vmatprep.subr.bf16.mxu1 %v3060_v12 }
  0x9c   :  { %3835 = vst [vmem:[#allocation25_spill] sm:$0xff] %v3126_v37 }
  0x9d   :  { %1671 = vmatpush1.bf16.msra.mxu0 %v3111_v3 }
  0x9e   :  { %1587 = vmatpush1.bf16.msra.mxu1 %v3078_v34  ;;  %1672 = vmatprep.subr.bf16.mxu0 %v3116_v5 }
  0x9f   :  { %1588 = vmatprep.subr.bf16.mxu1 %v3084_v48 }
  0xa1   :  { %1673 = vmatpush1.bf16.msra.mxu0 %v3126_v37 }
  0xa2   :  { %1589 = vmatpush1.bf16.msra.mxu1 %v3107_v13  ;;  %1888 = vmatprep.subr.bf16.mxu0 %v2748_v39  ;;  %v760_v39 = vld [vmem:[%s3780_s3 + $0x8] sm:$0xff] }
  0xa3   :  { %1590 = vmatprep.subr.bf16.mxu1 %v3113_v21 }
  0xa6   :  { %1591 = vmatpush1.bf16.msra.mxu1 %v3121_v19 }
  0xe1   :  { %v2446_v11 = vpop.f32.mrb[0].mxu0 }
  0xe2   :  { %v417_v59 = vadd.f32 %v2446_v11, %v3104_v61  ;;  %v408_v53 = vpop.f32.mrb[1].mxu0 }
  0xe3   :  { %v409_v43 = vadd.f32 %v3104_v61, %v408_v53  ;;  %v2447_v18 = vpop.f32.mrb[2].mxu0 }
  0xe4   :  { %v420_v28 = vadd.f32 %v2447_v18, %v3104_v61  ;;  %v411_v29 = vpop.f32.mrb[3].mxu0  ;;  %v665_v11 = vmax.f32 %v417_v59, 0.0 }
  0xe5   :  { %v412_v35 = vadd.f32 %v3104_v61, %v411_v29  ;;  %v663_v41 = vmax.f32 %v409_v43, 0.0 }
  0xe6   :  { %v666_v53 = vmax.f32 %v420_v28, 0.0 }
  0xe7   :  { %v664_v33 = vmax.f32 %v412_v35, 0.0 }
  0xe8   :  { %v728_v27 = vpack.c.bf16 %v666_v53, %v665_v11 }
  0xe9   :  { %v2450_v49 = vpop.f32.mrb[4].mxu0  ;;  %v727_v18 = vpack.c.bf16 %v664_v33, %v663_v41  ;;  %v764_v33 = vld [vmem:[%s3780_s3 + $0x28] sm:$0xff] }
  0xea   :  { %v433_v51 = vadd.f32 %v2450_v49, %v3104_v61  ;;  %v424_v60 = vpop.f32.mrb[5].mxu0  ;;  %v3143_v49 = vcombine.high %v760_v39, %v764_v33 }
  0xeb   :  { %v425_v29 = vadd.f32 %v3104_v61, %v424_v60  ;;  %v2451_v3 = vpop.f32.mrb[6].mxu0  ;;  %888 = vxpose.xlu1.c.b16.start [1/8] (narrow) %v727_v18, 16  ;;  %v3145_v60 = vcombine.low %v760_v39, %v764_v33 }
  0xec   :  { %v436_v59 = vadd.f32 %v2451_v3, %v3104_v61  ;;  %v427_v43 = vpop.f32.mrb[7].mxu0  ;;  %v669_v28 = vmax.f32 %v433_v51, 0.0  ;;  %3836 = vst [vmem:[#allocation26_spill] sm:$0xff] %v3143_v49  ;;  %1601 = vmatprep.subr.bf16.mxu1 %v3143_v49 }
  0xed   :  { %v428_v35 = vadd.f32 %v3104_v61, %v427_v43  ;;  %v667_v53 = vmax.f32 %v425_v29, 0.0 }
  0xee   :  { %v670_v11 = vmax.f32 %v436_v59, 0.0 }
  0xef   :  { %v668_v37 = vmax.f32 %v428_v35, 0.0  ;;  %889 = vxpose.xlu1.c.b16.cont [2/8] (narrow) %v728_v27, 16 }
  0xf0   :  { %v730_v41 = vpack.c.bf16 %v670_v11, %v669_v28 }
  0xf1   :  { %v2454_v3 = vpop.f32.mrb[8].mxu0  ;;  %v729_v18 = vpack.c.bf16 %v668_v37, %v667_v53 }
  0xf2   :  { %v449_v51 = vadd.f32 %v2454_v3, %v3104_v61  ;;  %v440_v29 = vpop.f32.mrb[9].mxu0 }
  0xf3   :  { %v441_v27 = vadd.f32 %v3104_v61, %v440_v29  ;;  %v2455_v59 = vpop.f32.mrb[10].mxu0  ;;  %890 = vxpose.xlu1.c.b16.cont [3/8] (narrow) %v729_v18, 16 }
  0xf4   :  { %v452_v43 = vadd.f32 %v2455_v59, %v3104_v61  ;;  %v443_v35 = vpop.f32.mrb[11].mxu0  ;;  %v673_v11 = vmax.f32 %v449_v51, 0.0 }
  0xf5   :  { %v444_v28 = vadd.f32 %v3104_v61, %v443_v35  ;;  %v671_v31 = vmax.f32 %v441_v27, 0.0 }
  0xf6   :  { %v674_v5 = vmax.f32 %v452_v43, 0.0 }
  0xf7   :  { %v672_v37 = vmax.f32 %v444_v28, 0.0  ;;  %891 = vxpose.xlu1.c.b16.cont [4/8] (narrow) %v730_v41, 16 }
  0xf8   :  { %v732_v53 = vpack.c.bf16 %v674_v5, %v673_v11 }
  0xf9   :  { %v2458_v39 = vpop.f32.mrb[12].mxu0  ;;  %v731_v33 = vpack.c.bf16 %v672_v37, %v671_v31 }
  0xfa   :  { %v465_v3 = vadd.f32 %v2458_v39, %v3104_v61  ;;  %v456_v49 = vpop.f32.mrb[13].mxu0 }
  0xfb   :  { %v457_v29 = vadd.f32 %v3104_v61, %v456_v49  ;;  %v2459_v25 = vpop.f32.mrb[14].mxu0  ;;  %892 = vxpose.xlu1.c.b16.cont [5/8] (narrow) %v731_v33, 16 }
  0xfc   :  { %v468_v18 = vadd.f32 %v2459_v25, %v3104_v61  ;;  %v459_v59 = vpop.f32.mrb[15].mxu0  ;;  %v677_v51 = vmax.f32 %v465_v3, 0.0 }
  0xfd   :  { %v460_v35 = vadd.f32 %v3104_v61, %v459_v59  ;;  %v675_v27 = vmax.f32 %v457_v29, 0.0 }
  0xfe   :  { %v678_v43 = vmax.f32 %v468_v18, 0.0 }
  0xff   :  { %v676_v28 = vmax.f32 %v460_v35, 0.0  ;;  %893 = vxpose.xlu1.c.b16.cont [6/8] (narrow) %v732_v53, 16 }
 0x100   :  { %v734_v5 = vpack.c.bf16 %v678_v43, %v677_v51 }
 0x101   :  { %v2462_v41 = vpop.f32.mrb[16].mxu0  ;;  %v733_v31 = vpack.c.bf16 %v676_v28, %v675_v27 }
 0x102   :  { %v481_v11 = vadd.f32 %v2462_v41, %v3104_v61  ;;  %v472_v37 = vpop.f32.mrb[17].mxu0 }
 0x103   :  { %v473_v49 = vadd.f32 %v3104_v61, %v472_v37  ;;  %v2463_v39 = vpop.f32.mrb[18].mxu0  ;;  %894 = vxpose.xlu1.c.b16.cont [7/8] (narrow) %v733_v31, 16 }
 0x104   :  { %v484_v25 = vadd.f32 %v2463_v39, %v3104_v61  ;;  %v475_v33 = vpop.f32.mrb[19].mxu0  ;;  %v681_v3 = vmax.f32 %v481_v11, 0.0 }
 0x105   :  { %v476_v59 = vadd.f32 %v3104_v61, %v475_v33  ;;  %v679_v29 = vmax.f32 %v473_v49, 0.0 }
 0x106   :  { %v682_v18 = vmax.f32 %v484_v25, 0.0 }
 0x107   :  { %v680_v35 = vmax.f32 %v476_v59, 0.0  ;;  %895 = vxpose.xlu1.c.b16.end [8/8] (narrow) %v734_v5, 16 }
 0x108   :  { %v736_v53 = vpack.c.bf16 %v682_v18, %v681_v3 }
 0x109   :  { %v2466_v51 = vpop.f32.mrb[20].mxu0  ;;  %v735_v43 = vpack.c.bf16 %v680_v35, %v679_v29 }
 0x10a   :  { %v497_v27 = vadd.f32 %v2466_v51, %v3104_v61  ;;  %v488_v28 = vpop.f32.mrb[21].mxu0 }
 0x10b   :  { %v489_v41 = vadd.f32 %v3104_v61, %v488_v28  ;;  %v2467_v37 = vpop.f32.mrb[22].mxu0  ;;  %904 = vxpose.xlu0.c.b16.start [1/8] (narrow) %v735_v43, 16 }
 0x10c   :  { %v500_v31 = vadd.f32 %v2467_v37, %v3104_v61  ;;  %v491_v39 = vpop.f32.mrb[23].mxu0  ;;  %v685_v11 = vmax.f32 %v497_v27, 0.0 }
 0x10d   :  { %v492_v33 = vadd.f32 %v3104_v61, %v491_v39  ;;  %v683_v49 = vmax.f32 %v489_v41, 0.0 }
 0x10e   :  { %v686_v25 = vmax.f32 %v500_v31, 0.0 }
 0x10f   :  { %v684_v59 = vmax.f32 %v492_v33, 0.0  ;;  %905 = vxpose.xlu0.c.b16.cont [2/8] (narrow) %v736_v53, 16 }
 0x110   :  { %v738_v5 = vpack.c.bf16 %v686_v25, %v685_v11 }
 0x111   :  { %v2470_v3 = vpop.f32.mrb[24].mxu0  ;;  %v737_v18 = vpack.c.bf16 %v684_v59, %v683_v49 }
 0x112   :  { %v513_v29 = vadd.f32 %v2470_v3, %v3104_v61  ;;  %v504_v35 = vpop.f32.mrb[25].mxu0 }
 0x113   :  { %v505_v51 = vadd.f32 %v3104_v61, %v504_v35  ;;  %v2471_v28 = vpop.f32.mrb[26].mxu0  ;;  %906 = vxpose.xlu0.c.b16.cont [3/8] (narrow) %v737_v18, 16 }
 0x114   :  { %v516_v43 = vadd.f32 %v2471_v28, %v3104_v61  ;;  %v507_v37 = vpop.f32.mrb[27].mxu0  ;;  %v689_v27 = vmax.f32 %v513_v29, 0.0 }
 0x115   :  { %v508_v39 = vadd.f32 %v3104_v61, %v507_v37  ;;  %v687_v41 = vmax.f32 %v505_v51, 0.0 }
 0x116   :  { %v690_v31 = vmax.f32 %v516_v43, 0.0 }
 0x117   :  { %v688_v33 = vmax.f32 %v508_v39, 0.0  ;;  %907 = vxpose.xlu0.c.b16.cont [4/8] (narrow) %v738_v5, 16 }
 0x118   :  { %v740_v53 = vpack.c.bf16 %v690_v31, %v689_v27 }
 0x119   :  { %v2474_v11 = vpop.f32.mrb[28].mxu0  ;;  %v739_v25 = vpack.c.bf16 %v688_v33, %v687_v41 }
 0x11a   :  { %v529_v49 = vadd.f32 %v2474_v11, %v3104_v61  ;;  %v520_v59 = vpop.f32.mrb[29].mxu0 }
 0x11b   :  { %v521_v3 = vadd.f32 %v3104_v61, %v520_v59  ;;  %v2475_v35 = vpop.f32.mrb[30].mxu0  ;;  %908 = vxpose.xlu0.c.b16.cont [5/8] (narrow) %v739_v25, 16 }
 0x11c   :  { %v532_v18 = vadd.f32 %v2475_v35, %v3104_v61  ;;  %v523_v28 = vpop.f32.mrb[31].mxu0  ;;  %v693_v29 = vmax.f32 %v529_v49, 0.0 }
 0x11d   :  { %v524_v37 = vadd.f32 %v3104_v61, %v523_v28  ;;  %v691_v51 = vmax.f32 %v521_v3, 0.0 }
 0x11e   :  { %v694_v43 = vmax.f32 %v532_v18, 0.0 }
 0x11f   :  { %v692_v39 = vmax.f32 %v524_v37, 0.0  ;;  %909 = vxpose.xlu0.c.b16.cont [6/8] (narrow) %v740_v53, 16 }
 0x120   :  { %v742_v5 = vpack.c.bf16 %v694_v43, %v693_v29 }
 0x121   :  { %v741_v27 = vpack.c.bf16 %v692_v39, %v691_v51  ;;  %v2478_v31 = vpop.f32.mrb[32].mxu0 }
 0x122   :  { %v545_v41 = vadd.f32 %v2478_v31, %v3104_v61  ;;  %v536_v33 = vpop.f32.mrb[33].mxu0 }
 0x123   :  { %910 = vxpose.xlu0.c.b16.cont [7/8] (narrow) %v741_v27, 16  ;;  %v537_v11 = vadd.f32 %v3104_v61, %v536_v33  ;;  %v2479_v25 = vpop.f32.mrb[34].mxu0 }
 0x124   :  { %v697_v59 = vmax.f32 %v545_v41, 0.0  ;;  %v548_v35 = vadd.f32 %v2479_v25, %v3104_v61  ;;  %v539_v23 = vpop.f32.mrb[35].mxu0 }
 0x125   :  { %v695_v28 = vmax.f32 %v537_v11, 0.0  ;;  %v540_v49 = vadd.f32 %v3104_v61, %v539_v23 }
 0x126   :  { %v698_v3 = vmax.f32 %v548_v35, 0.0 }
 0x127   :  { %911 = vxpose.xlu0.c.b16.end [8/8] (narrow) %v742_v5, 16  ;;  %v696_v53 = vmax.f32 %v540_v49, 0.0 }
 0x128   :  { %v744_v18 = vpack.c.bf16 %v698_v3, %v697_v59 }
 0x129   :  { %v2482_v37 = vpop.f32.mrb[36].mxu0  ;;  %v743_v29 = vpack.c.bf16 %v696_v53, %v695_v28 }
 0x12a   :  { %v561_v43 = vadd.f32 %v2482_v37, %v3104_v61  ;;  %v552_v51 = vpop.f32.mrb[37].mxu0 }
 0x12b   :  { %v553_v39 = vadd.f32 %v3104_v61, %v552_v51  ;;  %v2483_v27 = vpop.f32.mrb[38].mxu0  ;;  %1856 = vxpose.xlu1.c.b16.start [1/8] (narrow) %v743_v29, 16 }
 0x12c   :  { %v701_v31 = vmax.f32 %v561_v43, 0.0  ;;  %v564_v41 = vadd.f32 %v2483_v27, %v3104_v61  ;;  %v555_v33 = vpop.f32.mrb[39].mxu0 }
 0x12d   :  { %v699_v11 = vmax.f32 %v553_v39, 0.0  ;;  %v556_v23 = vadd.f32 %v3104_v61, %v555_v33 }
 0x12e   :  { %v702_v25 = vmax.f32 %v564_v41, 0.0 }
 0x12f   :  { %v700_v5 = vmax.f32 %v556_v23, 0.0  ;;  %1857 = vxpose.xlu1.c.b16.cont [2/8] (narrow) %v744_v18, 16 }
 0x130   :  { %v746_v59 = vpack.c.bf16 %v702_v25, %v701_v31 }
 0x131   :  { %v745_v35 = vpack.c.bf16 %v700_v5, %v699_v11  ;;  %v2486_v28 = vpop.f32.mrb[40].mxu0 }
 0x132   :  { %v577_v49 = vadd.f32 %v2486_v28, %v3104_v61  ;;  %v568_v3 = vpop.f32.mrb[41].mxu0 }
 0x133   :  { %v569_v53 = vadd.f32 %v3104_v61, %v568_v3  ;;  %v2487_v37 = vpop.f32.mrb[42].mxu0  ;;  %1858 = vxpose.xlu1.c.b16.cont [3/8] (narrow) %v745_v35, 16 }
 0x134   :  { %v705_v29 = vmax.f32 %v577_v49, 0.0  ;;  %v580_v43 = vadd.f32 %v2487_v37, %v3104_v61  ;;  %v571_v51 = vpop.f32.mrb[43].mxu0 }
 0x135   :  { %v703_v39 = vmax.f32 %v569_v53, 0.0  ;;  %v572_v27 = vadd.f32 %v3104_v61, %v571_v51 }
 0x136   :  { %v706_v41 = vmax.f32 %v580_v43, 0.0 }
 0x137   :  { %v704_v33 = vmax.f32 %v572_v27, 0.0  ;;  %1859 = vxpose.xlu1.c.b16.cont [4/8] (narrow) %v746_v59, 16 }
 0x138   :  { %v748_v18 = vpack.c.bf16 %v706_v41, %v705_v29 }
 0x139   :  { %v747_v31 = vpack.c.bf16 %v704_v33, %v703_v39  ;;  %v2490_v11 = vpop.f32.mrb[44].mxu0 }
 0x13a   :  { %v593_v23 = vadd.f32 %v2490_v11, %v3104_v61  ;;  %v584_v25 = vpop.f32.mrb[45].mxu0 }
 0x13b   :  { %v585_v5 = vadd.f32 %v3104_v61, %v584_v25  ;;  %v2491_v28 = vpop.f32.mrb[46].mxu0  ;;  %1860 = vxpose.xlu1.c.b16.cont [5/8] (narrow) %v747_v31, 16 }
 0x13c   :  { %v709_v35 = vmax.f32 %v593_v23, 0.0  ;;  %v596_v49 = vadd.f32 %v2491_v28, %v3104_v61  ;;  %v587_v3 = vpop.f32.mrb[47].mxu0 }
 0x13d   :  { %v707_v53 = vmax.f32 %v585_v5, 0.0  ;;  %v588_v37 = vadd.f32 %v3104_v61, %v587_v3 }
 0x13e   :  { %v710_v43 = vmax.f32 %v596_v49, 0.0 }
 0x13f   :  { %v708_v51 = vmax.f32 %v588_v37, 0.0  ;;  %1861 = vxpose.xlu1.c.b16.cont [6/8] (narrow) %v748_v18, 16 }
 0x140   :  { %v750_v59 = vpack.c.bf16 %v710_v43, %v709_v35 }
 0x141   :  { %v749_v29 = vpack.c.bf16 %v708_v51, %v707_v53  ;;  %v2494_v39 = vpop.f32.mrb[48].mxu0 }
 0x142   :  { %v609_v27 = vadd.f32 %v2494_v39, %v3104_v61  ;;  %v600_v41 = vpop.f32.mrb[49].mxu0 }
 0x143   :  { %v601_v33 = vadd.f32 %v3104_v61, %v600_v41  ;;  %v2495_v11 = vpop.f32.mrb[50].mxu0  ;;  %1862 = vxpose.xlu1.c.b16.cont [7/8] (narrow) %v749_v29, 16 }
 0x144   :  { %v713_v31 = vmax.f32 %v609_v27, 0.0  ;;  %v612_v23 = vadd.f32 %v2495_v11, %v3104_v61  ;;  %v603_v25 = vpop.f32.mrb[51].mxu0 }
 0x145   :  { %v711_v5 = vmax.f32 %v601_v33, 0.0  ;;  %v604_v28 = vadd.f32 %v3104_v61, %v603_v25 }
 0x146   :  { %v714_v49 = vmax.f32 %v612_v23, 0.0 }
 0x147   :  { %v712_v3 = vmax.f32 %v604_v28, 0.0  ;;  %1863 = vxpose.xlu1.c.b16.end [8/8] (narrow) %v750_v59, 16 }
 0x148   :  { %v752_v18 = vpack.c.bf16 %v714_v49, %v713_v31 }
 0x149   :  { %v2498_v35 = vpop.f32.mrb[52].mxu0  ;;  %v751_v53 = vpack.c.bf16 %v712_v3, %v711_v5 }
 0x14a   :  { %v625_v37 = vadd.f32 %v2498_v35, %v3104_v61  ;;  %v616_v43 = vpop.f32.mrb[53].mxu0 }
 0x14b   :  { %v617_v51 = vadd.f32 %v3104_v61, %v616_v43  ;;  %v2499_v39 = vpop.f32.mrb[54].mxu0  ;;  %1872 = vxpose.xlu0.c.b16.start [1/8] (narrow) %v751_v53, 16 }
 0x14c   :  { %v717_v29 = vmax.f32 %v625_v37, 0.0  ;;  %v628_v27 = vadd.f32 %v2499_v39, %v3104_v61  ;;  %v619_v41 = vpop.f32.mrb[55].mxu0 }
 0x14d   :  { %v715_v33 = vmax.f32 %v617_v51, 0.0  ;;  %v620_v11 = vadd.f32 %v3104_v61, %v619_v41 }
 0x14e   :  { %v718_v23 = vmax.f32 %v628_v27, 0.0 }
 0x14f   :  { %v716_v25 = vmax.f32 %v620_v11, 0.0  ;;  %1873 = vxpose.xlu0.c.b16.cont [2/8] (narrow) %v752_v18, 16 }
 0x150   :  { %v754_v59 = vpack.c.bf16 %v718_v23, %v717_v29 }
 0x151   :  { %v753_v31 = vpack.c.bf16 %v716_v25, %v715_v33  ;;  %v2502_v5 = vpop.f32.mrb[56].mxu0 }
 0x152   :  { %v641_v28 = vadd.f32 %v2502_v5, %v3104_v61  ;;  %v632_v49 = vpop.f32.mrb[57].mxu0 }
 0x153   :  { %v633_v3 = vadd.f32 %v3104_v61, %v632_v49  ;;  %v2503_v35 = vpop.f32.mrb[58].mxu0  ;;  %1874 = vxpose.xlu0.c.b16.cont [3/8] (narrow) %v753_v31, 16 }
 0x154   :  { %v721_v53 = vmax.f32 %v641_v28, 0.0  ;;  %v644_v37 = vadd.f32 %v2503_v35, %v3104_v61  ;;  %v635_v43 = vpop.f32.mrb[59].mxu0 }
 0x155   :  { %v719_v51 = vmax.f32 %v633_v3, 0.0  ;;  %v636_v39 = vadd.f32 %v3104_v61, %v635_v43 }
 0x156   :  { %v722_v27 = vmax.f32 %v644_v37, 0.0 }
 0x157   :  { %v720_v41 = vmax.f32 %v636_v39, 0.0  ;;  %1875 = vxpose.xlu0.c.b16.cont [4/8] (narrow) %v754_v59, 16  ;;  %v772_v39 = vld [vmem:[%s3780_s3 + $0x68] sm:$0xff] }
 0x158   :  { %v756_v18 = vpack.c.bf16 %v722_v27, %v721_v53  ;;  %v3210_v27 = vpop.trf.xlu1 }
 0x159   :  { %v755_v29 = vpack.c.bf16 %v720_v41, %v719_v51  ;;  %v2506_v33 = vpop.f32.mrb[60].mxu0  ;;  %v768_v51 = vld [vmem:[%s3780_s3 + $0x48] sm:$0xff] }
 0x15a   :  { %v657_v11 = vadd.f32 %v2506_v33, %v3104_v61  ;;  %v648_v23 = vpop.f32.mrb[61].mxu0  ;;  %v3228_v33 = vcombine.low %v768_v51, %v772_v39 }
 0x15b   :  { %v649_v25 = vadd.f32 %v3104_v61, %v648_v23  ;;  %v2507_v5 = vpop.f32.mrb[62].mxu0  ;;  %1876 = vxpose.xlu0.c.b16.cont [5/8] (narrow) %v755_v29, 16  ;;  %v780_v29 = vld [vmem:[%s3780_s3 + $0xa8] sm:$0xff] }
 0x15c   :  { %v725_v31 = vmax.f32 %v657_v11, 0.0  ;;  %v660_v28 = vadd.f32 %v2507_v5, %v3104_v61  ;;  %v651_v49 = vpop.f32.mrb[63].mxu0  ;;  %v784_v23 = vld [vmem:[%s3780_s3 + $0xc8] sm:$0xff] }
 0x15d   :  { %v723_v3 = vmax.f32 %v649_v25, 0.0  ;;  %v652_v35 = vadd.f32 %v3104_v61, %v651_v49  ;;  %v3214_v61 = vcombine.high %v768_v51, %v772_v39  ;;  %v788_v25 = vld [vmem:[%s3780_s3 + $0xe8] sm:$0xff] }
 0x15e   :  { %v726_v37 = vmax.f32 %v660_v28, 0.0  ;;  %v796_v28 = vld [vmem:[%s3780_s3 + $0x128] sm:$0xff] }
 0x15f   :  { %v724_v43 = vmax.f32 %v652_v35, 0.0  ;;  %1877 = vxpose.xlu0.c.b16.cont [6/8] (narrow) %v756_v18, 16  ;;  %v776_v18 = vld [vmem:[%s3780_s3 + $0x88] sm:$0xff] }
 0x160   :  { %v758_v59 = vpack.c.bf16 %v726_v37, %v725_v31  ;;  %v3231_v11 = vcombine.high %v776_v18, %v780_v29  ;;  %v3242_v5 = vcombine.low %v776_v18, %v780_v29  ;;  %v3245_v31 = vcombine.high %v784_v23, %v788_v25  ;;  %v812_v37 = vld [vmem:[%s3780_s3 + $0x1a8] sm:$0xff] }
 0x161   :  { %v757_v53 = vpack.c.bf16 %v724_v43, %v723_v3  ;;  %v804_v3 = vld [vmem:[%s3780_s3 + $0x168] sm:$0xff] }
 0x162   :  { %v828_v51 = vld [vmem:[%s3780_s3 + $0x228] sm:$0xff] }
 0x163   :  { %1878 = vxpose.xlu0.c.b16.cont [7/8] (narrow) %v757_v53, 16  ;;  %v836_v18 = vld [vmem:[%s3780_s3 + $0x268] sm:$0xff] }
 0x167   :  { %1879 = vxpose.xlu0.c.b16.end [8/8] (narrow) %v758_v59, 16  ;;  %v820_v59 = vld [vmem:[%s3780_s3 + $0x1e8] sm:$0xff] }
 0x171   :  { %v3212_v41 = vpop.trf.xlu0 }
 0x172   :  { %1592 = vmatprep.mubr.bf16.mxu1 %v3212_v41  ;;  %1674 = vmatprep.mubr.bf16.mxu0 %v3212_v41 }
 0x173   :  { %1593 = vmatmul.mubr.bf16.vlgmr.msra.gmra.mrb[0].mxu1 %v3210_v27  ;;  %1675 = vmatmul.mubr.bf16.vlgmr.msra.gmra.mrb[64].mxu0 %v3210_v27 }
 0x174   :  { %1602 = vmatpush1.bf16.msra.mxu1 %v3145_v60  ;;  %1633 = vmatprep.mubr.bf16.mxu1 %v3212_v41 }
 0x175   :  { %1603 = vmatprep.subr.bf16.mxu1 %v3214_v61  ;;  %1889 = vmatpush1.bf16.msra.mxu0 %v2750_v40  ;;  %v792_v40 = vld [vmem:[%s3780_s3 + $0x108] sm:$0xff] }
 0x176   :  { %1890 = vmatprep.subr.bf16.mxu0 %v2765_v46  ;;  %v3256_v46 = vcombine.low %v784_v23, %v788_v25  ;;  %v3259_v49 = vcombine.high %v792_v40, %v796_v28  ;;  %v844_v23 = vld [vmem:[%s3780_s3 + $0x2a8] sm:$0xff] }
 0x178   :  { %1604 = vmatpush1.bf16.msra.mxu1 %v3228_v33 }
 0x179   :  { %1605 = vmatprep.subr.bf16.mxu1 %v3231_v11  ;;  %1891 = vmatpush1.bf16.msra.mxu0 %v2790_v54  ;;  %v800_v54 = vld [vmem:[%s3780_s3 + $0x148] sm:$0xff] }
 0x17a   :  { %1892 = vmatprep.subr.bf16.mxu0 %v2796_v56  ;;  %v3270_v56 = vcombine.low %v792_v40, %v796_v28  ;;  %v3273_v35 = vcombine.high %v800_v54, %v804_v3  ;;  %v852_v40 = vld [vmem:[%s3780_s3 + $0x2e8] sm:$0xff] }
 0x17c   :  { %1606 = vmatpush1.bf16.msra.mxu1 %v3242_v5 }
 0x17d   :  { %1607 = vmatprep.subr.bf16.mxu1 %v3245_v31  ;;  %1893 = vmatpush1.bf16.msra.mxu0 %v2814_v62  ;;  %v808_v62 = vld [vmem:[%s3780_s3 + $0x188] sm:$0xff] }
 0x17e   :  { %1894 = vmatprep.subr.bf16.mxu0 %v2820_v0  ;;  %v3284_v0 = vcombine.low %v800_v54, %v804_v3  ;;  %v3287_v43 = vcombine.high %v808_v62, %v812_v37  ;;  %v860_v54 = vld [vmem:[%s3780_s3 + $0x328] sm:$0xff] }
 0x180   :  { %1608 = vmatpush1.bf16.msra.mxu1 %v3256_v46 }
 0x181   :  { %1609 = vmatprep.subr.bf16.mxu1 %v3259_v49  ;;  %1895 = vmatpush1.bf16.msra.mxu0 %v2838_v6  ;;  %v816_v6 = vld [vmem:[%s3780_s3 + $0x1c8] sm:$0xff] }
 0x182   :  { %1896 = vmatprep.subr.bf16.mxu0 %v2844_v8  ;;  %v3298_v8 = vcombine.low %v808_v62, %v812_v37  ;;  %v3301_v53 = vcombine.high %v816_v6, %v820_v59  ;;  %v868_v62 = vld [vmem:[%s3780_s3 + $0x368] sm:$0xff] }
 0x184   :  { %1610 = vmatpush1.bf16.msra.mxu1 %v3270_v56 }
 0x185   :  { %1611 = vmatprep.subr.bf16.mxu1 %v3273_v35  ;;  %1897 = vmatpush1.bf16.msra.mxu0 %v2862_v14  ;;  %v824_v14 = vld [vmem:[%s3780_s3 + $0x208] sm:$0xff] }
 0x186   :  { %1898 = vmatprep.subr.bf16.mxu0 %v2868_v16  ;;  %v3312_v16 = vcombine.low %v816_v6, %v820_v59  ;;  %v3315_v39 = vcombine.high %v824_v14, %v828_v51  ;;  %v876_v6 = vld [vmem:[%s3780_s3 + $0x3a8] sm:$0xff] }
 0x188   :  { %1612 = vmatpush1.bf16.msra.mxu1 %v3284_v0 }
 0x189   :  { %1613 = vmatprep.subr.bf16.mxu1 %v3287_v43  ;;  %1899 = vmatpush1.bf16.msra.mxu0 %v2886_v22  ;;  %v832_v22 = vld [vmem:[%s3780_s3 + $0x248] sm:$0xff] }
 0x18a   :  { %1900 = vmatprep.subr.bf16.mxu0 %v2892_v24  ;;  %v3326_v24 = vcombine.low %v824_v14, %v828_v51  ;;  %v3329_v29 = vcombine.high %v832_v22, %v836_v18  ;;  %v884_v14 = vld [vmem:[%s3780_s3 + $0x3e8] sm:$0xff] }
 0x18c   :  { %1614 = vmatpush1.bf16.msra.mxu1 %v3298_v8 }
 0x18d   :  { %1615 = vmatprep.subr.bf16.mxu1 %v3301_v53  ;;  %1901 = vmatpush1.bf16.msra.mxu0 %v2910_v30  ;;  %v840_v30 = vld [vmem:[%s3780_s3 + $0x288] sm:$0xff] }
 0x18e   :  { %1902 = vmatprep.subr.bf16.mxu0 %v2916_v32  ;;  %v3340_v32 = vcombine.low %v832_v22, %v836_v18  ;;  %v3343_v25 = vcombine.high %v840_v30, %v844_v23  ;;  %v766_v22 = vld [vmem:[%s3780_s3 + $0x38] sm:$0xff] }
 0x190   :  { %1616 = vmatpush1.bf16.msra.mxu1 %v3312_v16 }
 0x191   :  { %1617 = vmatprep.subr.bf16.mxu1 %v3315_v39  ;;  %1903 = vmatpush1.bf16.msra.mxu0 %v2934_v38  ;;  %v848_v38 = vld [vmem:[%s3780_s3 + $0x2c8] sm:$0xff] }
 0x192   :  { %1904 = vmatprep.subr.bf16.mxu0 %v2940_v42  ;;  %v3354_v42 = vcombine.low %v840_v30, %v844_v23  ;;  %v3357_v28 = vcombine.high %v848_v38, %v852_v40  ;;  %v774_v30 = vld [vmem:[%s3780_s3 + $0x78] sm:$0xff] }
 0x194   :  { %1618 = vmatpush1.bf16.msra.mxu1 %v3326_v24 }
 0x195   :  { %1619 = vmatprep.subr.bf16.mxu1 %v3329_v29  ;;  %1905 = vmatpush1.bf16.msra.mxu0 %v2958_v52  ;;  %v856_v52 = vld [vmem:[%s3780_s3 + $0x308] sm:$0xff] }
 0x196   :  { %1906 = vmatprep.subr.bf16.mxu0 %v2964_v58  ;;  %v3368_v58 = vcombine.low %v848_v38, %v852_v40  ;;  %v3371_v3 = vcombine.high %v856_v52, %v860_v54  ;;  %v778_v38 = vld [vmem:[%s3780_s3 + $0x98] sm:$0xff]  ;;  %v3454_v40 = vpop.trf.xlu1 }
 0x198   :  { %1620 = vmatpush1.bf16.msra.mxu1 %v3340_v32 }
 0x199   :  { %1621 = vmatprep.subr.bf16.mxu1 %v3343_v25  ;;  %1907 = vmatpush1.bf16.msra.mxu0 %v2982_v4  ;;  %v864_v4 = vld [vmem:[%s3780_s3 + $0x348] sm:$0xff] }
 0x19a   :  { %1908 = vmatprep.subr.bf16.mxu0 %v2988_v10  ;;  %v3382_v10 = vcombine.low %v856_v52, %v860_v54  ;;  %v3385_v37 = vcombine.high %v864_v4, %v868_v62  ;;  %v790_v54 = vld [vmem:[%s3780_s3 + $0xf8] sm:$0xff] }
 0x19c   :  { %1622 = vmatpush1.bf16.msra.mxu1 %v3354_v42 }
 0x19d   :  { %1623 = vmatprep.subr.bf16.mxu1 %v3357_v28  ;;  %1909 = vmatpush1.bf16.msra.mxu0 %v3006_v20  ;;  %v872_v20 = vld [vmem:[%s3780_s3 + $0x388] sm:$0xff] }
 0x19e   :  { %1910 = vmatprep.subr.bf16.mxu0 %v3012_v26  ;;  %v3396_v26 = vcombine.low %v864_v4, %v868_v62  ;;  %v3399_v59 = vcombine.high %v872_v20, %v876_v6  ;;  %v794_v62 = vld [vmem:[%s3780_s3 + $0x118] sm:$0xff] }
 0x1a0   :  { %1624 = vmatpush1.bf16.msra.mxu1 %v3368_v58 }
 0x1a1   :  { %1625 = vmatprep.subr.bf16.mxu1 %v3371_v3  ;;  %1911 = vmatpush1.bf16.msra.mxu0 %v3030_v36  ;;  %v880_v36 = vld [vmem:[%s3780_s3 + $0x3c8] sm:$0xff] }
 0x1a2   :  { %1912 = vmatprep.subr.bf16.mxu0 %v3036_v47  ;;  %v3410_v47 = vcombine.low %v872_v20, %v876_v6  ;;  %v3413_v51 = vcombine.high %v880_v36, %v884_v14  ;;  %v802_v6 = vld [vmem:[%s3780_s3 + $0x158] sm:$0xff] }
 0x1a4   :  { %1626 = vmatpush1.bf16.msra.mxu1 %v3382_v10 }
 0x1a5   :  { %1627 = vmatprep.subr.bf16.mxu1 %v3385_v37  ;;  %1913 = vmatpush1.bf16.msra.mxu0 %v3054_v2  ;;  %v762_v2 = vld [vmem:[%s3780_s3 + $0x18] sm:$0xff] }
 0x1a6   :  { %1914 = vmatprep.subr.bf16.mxu0 %v3060_v12  ;;  %v3424_v12 = vcombine.low %v880_v36, %v884_v14  ;;  %v3427_v18 = vcombine.high %v762_v2, %v766_v22  ;;  %v806_v36 = vld [vmem:[%s3780_s3 + $0x178] sm:$0xff] }
 0x1a7   :  { %v810_v14 = vld [vmem:[%s3780_s3 + $0x198] sm:$0xff] }
 0x1a8   :  { %1628 = vmatpush1.bf16.msra.mxu1 %v3396_v26 }
 0x1a9   :  { %1629 = vmatprep.subr.bf16.mxu1 %v3399_v59  ;;  %1915 = vmatpush1.bf16.msra.mxu0 %v3078_v34  ;;  %v770_v34 = vld [vmem:[%s3780_s3 + $0x58] sm:$0xff] }
 0x1aa   :  { %1916 = vmatprep.subr.bf16.mxu0 %v3084_v48  ;;  %v3438_v48 = vcombine.low %v762_v2, %v766_v22  ;;  %v3441_v23 = vcombine.high %v770_v34, %v774_v30  ;;  %v814_v2 = vld [vmem:[%s3780_s3 + $0x1b8] sm:$0xff] }
 0x1ab   :  { %v818_v22 = vld [vmem:[%s3780_s3 + $0x1d8] sm:$0xff] }
 0x1ac   :  { %1630 = vmatpush1.bf16.msra.mxu1 %v3410_v47 }
 0x1ad   :  { %1631 = vmatprep.subr.bf16.mxu1 %v3413_v51  ;;  %1917 = vmatpush1.bf16.msra.mxu0 %v3107_v13 }
 0x1ae   :  { %1918 = vmatprep.subr.bf16.mxu0 %v3113_v21  ;;  %v782_v21 = vld [vmem:[%s3780_s3 + $0xb8] sm:$0xff] }
 0x1af   :  { %v3462_v52 = vcombine.high %v778_v38, %v782_v21 }
 0x1b0   :  { %1632 = vmatpush1.bf16.msra.mxu1 %v3424_v12 }
 0x1b1   :  { %1683 = vmatprep.subr.bf16.mxu1 %v3427_v18  ;;  %1919 = vmatpush1.bf16.msra.mxu0 %v3121_v19  ;;  %v3444_v13 = vpop.trf.xlu0  ;;  %v3459_v19 = vcombine.low %v770_v34, %v774_v30  ;;  %v822_v34 = vld [vmem:[%s3780_s3 + $0x1f8] sm:$0xff] }
 0x1b2   :  { %1920 = vmatprep.mubr.bf16.mxu0 %v3444_v13  ;;  %1970 = vmatprep.subr.bf16.mxu0 %v2763_v45  ;;  %v786_v45 = vld [vmem:[%s3780_s3 + $0xd8] sm:$0xff] }
 0x1b3   :  { %1634 = vmatmul.mubr.bf16.vlgmr.msra.gmra.mrb[4].mxu1 %v3210_v27  ;;  %v3478_v4 = vcombine.high %v786_v45, %v790_v54  ;;  %v826_v30 = vld [vmem:[%s3780_s3 + $0x218] sm:$0xff] }
 0x1b4   :  { %1684 = vmatpush1.bf16.msra.mxu1 %v3438_v48  ;;  %1715 = vmatprep.mubr.bf16.mxu1 %v3212_v41  ;;  %v3475_v41 = vcombine.low %v778_v38, %v782_v21  ;;  %v830_v38 = vld [vmem:[%s3780_s3 + $0x238] sm:$0xff]  ;;  %v3837_v21 = vld [vmem:[#allocation5_spill] sm:$0xff] }
 0x1b5   :  { %1685 = vmatprep.subr.bf16.mxu1 %v3441_v23  ;;  %1921 = vmatmul.mubr.bf16.vlgmr.msra.gmra.mrb[68].mxu0 %v3454_v40 }
 0x1b6   :  { %1971 = vmatpush1.bf16.msra.mxu0 %v2761_v44  ;;  %2002 = vmatprep.mubr.bf16.mxu0 %v3444_v13  ;;  %v798_v44 = vld [vmem:[%s3780_s3 + $0x138] sm:$0xff] }
 0x1b7   :  { %1972 = vmatprep.subr.bf16.mxu0 %v2777_v50  ;;  %v3489_v50 = vcombine.low %v786_v45, %v790_v54  ;;  %v3492_v20 = vcombine.high %v794_v62, %v798_v44  ;;  %v3548_v45 = vcombine.high %v826_v30, %v830_v38  ;;  %v834_v54 = vld [vmem:[%s3780_s3 + $0x258] sm:$0xff] }
 0x1b8   :  { %1686 = vmatpush1.bf16.msra.mxu1 %v3459_v19 }
 0x1b9   :  { %1687 = vmatprep.subr.bf16.mxu1 %v3462_v52 }
 0x1ba   :  { %1973 = vmatpush1.bf16.msra.mxu0 %v2794_v55  ;;  %v3503_v55 = vcombine.low %v794_v62, %v798_v44  ;;  %v838_v62 = vld [vmem:[%s3780_s3 + $0x278] sm:$0xff] }
 0x1bb   :  { %1974 = vmatprep.subr.bf16.mxu0 %v2799_v57  ;;  %v3506_v57 = vcombine.high %v802_v6, %v806_v36  ;;  %v3839_v44 = vld [vmem:[#allocation7_spill] sm:$0xff] }
 0x1bc   :  { %1688 = vmatpush1.bf16.msra.mxu1 %v3475_v41 }
 0x1bd   :  { %1689 = vmatprep.subr.bf16.mxu1 %v3478_v4 }
 0x1be   :  { %1975 = vmatpush1.bf16.msra.mxu0 %v2818_v63  ;;  %v3517_v63 = vcombine.low %v802_v6, %v806_v36  ;;  %v3840_v6 = vld [vmem:[#allocation8_spill] sm:$0xff]  ;;  %v3559_v36 = vcombine.low %v826_v30, %v830_v38  ;;  %v3573_v30 = vcombine.low %v834_v54, %v838_v62 }
 0x1bf   :  { %1976 = vmatprep.subr.bf16.mxu0 %v2823_v1  ;;  %v3520_v1 = vcombine.high %v810_v14, %v814_v2 }
 0x1c0   :  { %1690 = vmatpush1.bf16.msra.mxu1 %v3489_v50  ;;  %3841 = vst [vmem:[#allocation5_spill] sm:$0xff] %v3559_v36  ;;  %3845 = vst [vmem:[#allocation7_spill] sm:$0xff] %v3573_v30 }
 0x1c1   :  { %1691 = vmatprep.subr.bf16.mxu1 %v3492_v20 }
 0x1c2   :  { %1977 = vmatpush1.bf16.msra.mxu0 %v2842_v7  ;;  %v3531_v7 = vcombine.low %v810_v14, %v814_v2  ;;  %v3562_v14 = vcombine.high %v834_v54, %v838_v62  ;;  %v842_v2 = vld [vmem:[%s3780_s3 + $0x298] sm:$0xff] }
 0x1c3   :  { %1978 = vmatprep.subr.bf16.mxu0 %v2847_v9  ;;  %v3534_v9 = vcombine.high %v818_v22, %v822_v34 }
 0x1c4   :  { %1692 = vmatpush1.bf16.msra.mxu1 %v3503_v55 }
 0x1c5   :  { %1693 = vmatprep.subr.bf16.mxu1 %v3506_v57 }
 0x1c6   :  { %1979 = vmatpush1.bf16.msra.mxu0 %v2866_v15  ;;  %v3838_v15 = vld [vmem:[#allocation6_spill] sm:$0xff] }
 0x1c7   :  { %1980 = vmatprep.subr.bf16.mxu0 %v2871_v17  ;;  %v3545_v17 = vcombine.low %v818_v22, %v822_v34  ;;  %3842 = vst [vmem:[#allocation6_spill] sm:$0xff] %v3562_v14  ;;  %v846_v22 = vld [vmem:[%s3780_s3 + $0x2b8] sm:$0xff]  ;;  %v3843_v34 = vld [vmem:[#allocation9_spill] sm:$0xff] }
 0x1c8   :  { %1694 = vmatpush1.bf16.msra.mxu1 %v3517_v63  ;;  %v3576_v38 = vcombine.high %v842_v2, %v846_v22  ;;  %v3587_v54 = vcombine.low %v842_v2, %v846_v22 }
 0x1c9   :  { %1695 = vmatprep.subr.bf16.mxu1 %v3520_v1 }
 0x1ca   :  { %1981 = vmatpush1.bf16.msra.mxu0 %v3837_v21  ;;  %v3844_v21 = vld [vmem:[#allocation10_spill] sm:$0xff]  ;;  %3846 = vst [vmem:[#allocation8_spill] sm:$0xff] %v3576_v38  ;;  %3849 = vst [vmem:[#allocation9_spill] sm:$0xff] %v3587_v54 }
 0x1cb   :  { %1982 = vmatprep.subr.bf16.mxu0 %v3838_v15  ;;  %v850_v15 = vld [vmem:[%s3780_s3 + $0x2d8] sm:$0xff] }
 0x1cc   :  { %1696 = vmatpush1.bf16.msra.mxu1 %v3531_v7 }
 0x1cd   :  { %1697 = vmatprep.subr.bf16.mxu1 %v3534_v9 }
 0x1ce   :  { %1983 = vmatpush1.bf16.msra.mxu0 %v3839_v44  ;;  %v854_v44 = vld [vmem:[%s3780_s3 + $0x2f8] sm:$0xff] }
 0x1cf   :  { %1984 = vmatprep.subr.bf16.mxu0 %v3840_v6  ;;  %v3847_v6 = vld [vmem:[#allocation11_spill] sm:$0xff]  ;;  %v3590_v62 = vcombine.high %v850_v15, %v854_v44  ;;  %v3601_v2 = vcombine.low %v850_v15, %v854_v44 }
 0x1d0   :  { %1698 = vmatpush1.bf16.msra.mxu1 %v3545_v17 }
 0x1d1   :  { %1699 = vmatprep.subr.bf16.mxu1 %v3548_v45  ;;  %3850 = vst [vmem:[#allocation10_spill] sm:$0xff] %v3590_v62  ;;  %3853 = vst [vmem:[#allocation11_spill] sm:$0xff] %v3601_v2 }
 0x1d2   :  { %1985 = vmatpush1.bf16.msra.mxu0 %v3843_v34  ;;  %v3848_v34 = vld [vmem:[#allocation12_spill] sm:$0xff] }
 0x1d3   :  { %1986 = vmatprep.subr.bf16.mxu0 %v3844_v21  ;;  %v858_v21 = vld [vmem:[%s3780_s3 + $0x318] sm:$0xff] }
 0x1d4   :  { %1700 = vmatpush1.bf16.msra.mxu1 %v3559_v36  ;;  %v3851_v36 = vld [vmem:[#allocation13_spill] sm:$0xff] }
 0x1d5   :  { %1701 = vmatprep.subr.bf16.mxu1 %v3562_v14  ;;  %v862_v14 = vld [vmem:[%s3780_s3 + $0x338] sm:$0xff] }
 0x1d6   :  { %1987 = vmatpush1.bf16.msra.mxu0 %v3847_v6  ;;  %v3852_v6 = vld [vmem:[#allocation14_spill] sm:$0xff]  ;;  %v3604_v22 = vcombine.high %v858_v21, %v862_v14  ;;  %v3615_v15 = vcombine.low %v858_v21, %v862_v14 }
 0x1d7   :  { %1988 = vmatprep.subr.bf16.mxu0 %v3848_v34  ;;  %v866_v34 = vld [vmem:[%s3780_s3 + $0x358] sm:$0xff] }
 0x1d8   :  { %1702 = vmatpush1.bf16.msra.mxu1 %v3573_v30  ;;  %3854 = vst [vmem:[#allocation12_spill] sm:$0xff] %v3604_v22  ;;  %v3855_v30 = vld [vmem:[#allocation15_spill] sm:$0xff]  ;;  %3857 = vst [vmem:[#allocation13_spill] sm:$0xff] %v3615_v15 }
 0x1d9   :  { %1703 = vmatprep.subr.bf16.mxu1 %v3576_v38  ;;  %v870_v38 = vld [vmem:[%s3780_s3 + $0x378] sm:$0xff] }
 0x1da   :  { %1989 = vmatpush1.bf16.msra.mxu0 %v3851_v36  ;;  %v3856_v36 = vld [vmem:[#allocation16_spill] sm:$0xff]  ;;  %v3618_v44 = vcombine.high %v866_v34, %v870_v38  ;;  %v3629_v14 = vcombine.low %v866_v34, %v870_v38 }
 0x1db   :  { %1990 = vmatprep.subr.bf16.mxu0 %v3852_v6  ;;  %v874_v6 = vld [vmem:[%s3780_s3 + $0x398] sm:$0xff] }
 0x1dc   :  { %1704 = vmatpush1.bf16.msra.mxu1 %v3587_v54  ;;  %3858 = vst [vmem:[#allocation14_spill] sm:$0xff] %v3618_v44  ;;  %v3859_v54 = vld [vmem:[#allocation17_spill] sm:$0xff] }
 0x1dd   :  { %1705 = vmatprep.subr.bf16.mxu1 %v3590_v62  ;;  %v878_v62 = vld [vmem:[%s3780_s3 + $0x3b8] sm:$0xff] }
 0x1de   :  { %1991 = vmatpush1.bf16.msra.mxu0 %v3855_v30  ;;  %v3860_v30 = vld [vmem:[#allocation18_spill] sm:$0xff]  ;;  %v3632_v21 = vcombine.high %v874_v6, %v878_v62  ;;  %v3643_v38 = vcombine.low %v874_v6, %v878_v62  ;;  %v3868_v6 = vld [vmem:[#allocation25_spill] sm:$0xff] }
 0x1df   :  { %1992 = vmatprep.subr.bf16.mxu0 %v3856_v36  ;;  %v882_v36 = vld [vmem:[%s3780_s3 + $0x3d8] sm:$0xff]  ;;  %v3867_v62 = vld [vmem:[#allocation26_spill] sm:$0xff] }
 0x1e0   :  { %1706 = vmatpush1.bf16.msra.mxu1 %v3601_v2  ;;  %v3861_v2 = vld [vmem:[#allocation19_spill] sm:$0xff] }
 0x1e1   :  { %1707 = vmatprep.subr.bf16.mxu1 %v3604_v22  ;;  %v886_v22 = vld [vmem:[%s3780_s3 + $0x3f8] sm:$0xff] }
 0x1e2   :  { %1993 = vmatpush1.bf16.msra.mxu0 %v3859_v54  ;;  %v3862_v54 = vld [vmem:[#allocation20_spill] sm:$0xff]  ;;  %v3646_v34 = vcombine.high %v882_v36, %v886_v22 }
 0x1e3   :  { %1994 = vmatprep.subr.bf16.mxu0 %v3860_v30  ;;  %v3863_v30 = vld [vmem:[#allocation21_spill] sm:$0xff] }
 0x1e4   :  { %1708 = vmatpush1.bf16.msra.mxu1 %v3615_v15  ;;  %v3651_v15 = vcombine.low %v882_v36, %v886_v22 }
 0x1e5   :  { %1709 = vmatprep.subr.bf16.mxu1 %v3618_v44  ;;  %v3864_v44 = vld [vmem:[#allocation22_spill] sm:$0xff] }
 0x1e6   :  { %1995 = vmatpush1.bf16.msra.mxu0 %v3861_v2  ;;  %v3865_v2 = vld [vmem:[#allocation23_spill] sm:$0xff] }
 0x1e7   :  { %1996 = vmatprep.subr.bf16.mxu0 %v3862_v54  ;;  %v3866_v54 = vld [vmem:[#allocation24_spill] sm:$0xff] }
 0x1e8   :  { %1710 = vmatpush1.bf16.msra.mxu1 %v3629_v14 }
 0x1e9   :  { %1711 = vmatprep.subr.bf16.mxu1 %v3632_v21 }
 0x1ea   :  { %1997 = vmatpush1.bf16.msra.mxu0 %v3863_v30 }
 0x1eb   :  { %1998 = vmatprep.subr.bf16.mxu0 %v3864_v44 }
 0x1ec   :  { %1712 = vmatpush1.bf16.msra.mxu1 %v3643_v38 }
 0x1ed   :  { %1713 = vmatprep.subr.bf16.mxu1 %v3646_v34 }
 0x1ee   :  { %1999 = vmatpush1.bf16.msra.mxu0 %v3865_v2 }
 0x1ef   :  { %2000 = vmatprep.subr.bf16.mxu0 %v3866_v54 }
 0x1f0   :  { %1714 = vmatpush1.bf16.msra.mxu1 %v3651_v15 }
 0x1f1   :  { %1929 = vmatprep.subr.bf16.mxu1 %v3867_v62 }
 0x1f2   :  { %2001 = vmatpush1.bf16.msra.mxu0 %v3868_v6 }
 0x1f3   :  { %1716 = vmatmul.mubr.bf16.vlgmr.msra.gmra.mrb[8].mxu1 %v3210_v27 }
 0x1f4   :  { %1930 = vmatpush1.bf16.msra.mxu1 %v3145_v60  ;;  %1961 = vmatprep.mubr.bf16.mxu1 %v3444_v13  ;;  %v2570_v60 = vmov 1966171168  }
 0x1f5   :  { %1931 = vmatprep.subr.bf16.mxu1 %v3214_v61  ;;  %2003 = vmatmul.mubr.bf16.vlgmr.msra.gmra.mrb[72].mxu0 %v3454_v40  ;;  %v1727_v27 = vunpack.c.l.s4 %v2570_v60  ;;  %v1729_v61 = vlaneseq }
 0x1f8   :  { %1932 = vmatpush1.bf16.msra.mxu1 %v3228_v33  ;;  %v1728_v33 = vunpack.c.0.s8 %v1727_v27 }
 0x1f9   :  { %1933 = vmatprep.subr.bf16.mxu1 %v3231_v11  ;;  %v3703_v11 = vshrl.u32 %v1729_v61, 7 }
 0x1fc   :  { %1934 = vmatpush1.bf16.msra.mxu1 %v3242_v5  ;;  %v3708_v5 = vsub.s32 %v1728_v33, %v3703_v11 }
 0x1fd   :  { %1935 = vmatprep.subr.bf16.mxu1 %v3245_v31 }
 0x200   :  { %1936 = vmatpush1.bf16.msra.mxu1 %v3256_v46 }
 0x201   :  { %1937 = vmatprep.subr.bf16.mxu1 %v3259_v49 }
 0x204   :  { %1938 = vmatpush1.bf16.msra.mxu1 %v3270_v56 }
 0x205   :  { %1939 = vmatprep.subr.bf16.mxu1 %v3273_v35 }
 0x208   :  { %1940 = vmatpush1.bf16.msra.mxu1 %v3284_v0 }
 0x209   :  { %1941 = vmatprep.subr.bf16.mxu1 %v3287_v43 }
 0x20c   :  { %1942 = vmatpush1.bf16.msra.mxu1 %v3298_v8  ;;  %v887_v8 = vld [vmem:[%s3781_s4] sm:$0x1]  ;;  %s2571_s4 = smov [#allocation2]  }
 0x20d   :  { %1943 = vmatprep.subr.bf16.mxu1 %v3301_v53  ;;  %s2199_s20 = sshll.u32 %s2571_s4, 4  ;;  %s2200_s20 = int_to_ptr.vmem [resolvable:$true] %s2199_s20 }
 0x20e   :  { %s2546_s21 = scalar_lea.vmem %s2200_s20, 32  ;;  %p2551_p1 = scmp.lt.s32.totalorder %s2200_s20, %s2200_s20 }
 0x20f   :  { %p2547_p0 = scmp.ne.s32.totalorder %s2200_s20, %s2546_s21  ;;  %p2552_p2 = scmp.lt.s32.totalorder %s2546_s21, %s2546_s21 }
 0x210   :  { %1944 = vmatpush1.bf16.msra.mxu1 %v3312_v16 }
 0x211   :  { %1945 = vmatprep.subr.bf16.mxu1 %v3315_v39  ;;  %p2553_p3 = por %p2552_p2, %p2551_p1 }
 0x213   :  { %p2554_p4 = pnand %p2553_p3, %p2547_p0 }
 0x214   :  { %1946 = vmatpush1.bf16.msra.mxu1 %v3326_v24 }
 0x215   :  { %1947 = vmatprep.subr.bf16.mxu1 %v3329_v29 }
 0x218   :  { %1948 = vmatpush1.bf16.msra.mxu1 %v3340_v32 }
 0x219   :  { %1949 = vmatprep.subr.bf16.mxu1 %v3343_v25  ;;  %v3869_v25 = vld [vmem:[#allocation5_spill] sm:$0xff] }
 0x21c   :  { %1950 = vmatpush1.bf16.msra.mxu1 %v3354_v42  ;;  %v3870_v42 = vld [vmem:[#allocation6_spill] sm:$0xff] }
 0x21d   :  { %1951 = vmatprep.subr.bf16.mxu1 %v3357_v28  ;;  %v3871_v28 = vld [vmem:[#allocation7_spill] sm:$0xff] }
 0x220   :  { %1952 = vmatpush1.bf16.msra.mxu1 %v3368_v58  ;;  %v3872_v58 = vld [vmem:[#allocation8_spill] sm:$0xff] }
 0x221   :  { %1953 = vmatprep.subr.bf16.mxu1 %v3371_v3  ;;  %v3873_v3 = vld [vmem:[#allocation9_spill] sm:$0xff] }
 0x224   :  { %1954 = vmatpush1.bf16.msra.mxu1 %v3382_v10  ;;  %v3874_v10 = vld [vmem:[#allocation10_spill] sm:$0xff] }
 0x225   :  { %1955 = vmatprep.subr.bf16.mxu1 %v3385_v37  ;;  %v3875_v37 = vld [vmem:[#allocation11_spill] sm:$0xff] }
 0x228   :  { %1956 = vmatpush1.bf16.msra.mxu1 %v3396_v26  ;;  %v3876_v26 = vld [vmem:[#allocation12_spill] sm:$0xff] }
 0x229   :  { %1957 = vmatprep.subr.bf16.mxu1 %v3399_v59  ;;  %v3877_v59 = vld [vmem:[#allocation13_spill] sm:$0xff] }
 0x22c   :  { %1958 = vmatpush1.bf16.msra.mxu1 %v3410_v47  ;;  %v3878_v47 = vld [vmem:[#allocation14_spill] sm:$0xff] }
 0x22d   :  { %1959 = vmatprep.subr.bf16.mxu1 %v3413_v51 }
 0x230   :  { %1960 = vmatpush1.bf16.msra.mxu1 %v3424_v12 }
 0x231   :  { %2011 = vmatprep.subr.bf16.mxu1 %v3427_v18 }
 0x233   :  { %1962 = vmatmul.mubr.bf16.vlgmr.msra.gmra.mrb[12].mxu1 %v3454_v40 }
 0x234   :  { %2012 = vmatpush1.bf16.msra.mxu1 %v3438_v48  ;;  %2043 = vmatprep.mubr.bf16.mxu1 %v3444_v13 }
 0x235   :  { %2013 = vmatprep.subr.bf16.mxu1 %v3441_v23 }
 0x238   :  { %2014 = vmatpush1.bf16.msra.mxu1 %v3459_v19 }
 0x239   :  { %2015 = vmatprep.subr.bf16.mxu1 %v3462_v52 }
 0x23c   :  { %2016 = vmatpush1.bf16.msra.mxu1 %v3475_v41 }
 0x23d   :  { %2017 = vmatprep.subr.bf16.mxu1 %v3478_v4 }
 0x240   :  { %2018 = vmatpush1.bf16.msra.mxu1 %v3489_v50 }
 0x241   :  { %2019 = vmatprep.subr.bf16.mxu1 %v3492_v20 }
 0x244   :  { %2020 = vmatpush1.bf16.msra.mxu1 %v3503_v55 }
 0x245   :  { %2021 = vmatprep.subr.bf16.mxu1 %v3506_v57 }
 0x246   :  { %v1594_v31 = vpop.f32.mrb[0].mxu1  ;;  %v1676_v46 = vpop.f32.mrb[64].mxu0 }
 0x247   :  { %v1596_v49 = vpop.f32.mrb[1].mxu1  ;;  %v1678_v56 = vpop.f32.mrb[65].mxu0  ;;  %v1724_v24 = vadd.f32 %v1594_v31, %v887_v8  ;;  %v1781_v23 = vcombine.high %v1676_v46, %v1676_v46 }
 0x248   :  { %v1732_v35 = vrot.slane %v1596_v49, %v3708_v5  ;;  %2022 = vmatpush1.bf16.msra.mxu1 %v3517_v63  ;;  %v1598_v0 = vpop.f32.mrb[2].mxu1  ;;  %v1680_v43 = vpop.f32.mrb[66].mxu0  ;;  %v1799_v51 = vcombine.high %v1678_v56, %v1678_v56 }
 0x249   :  { %v1599_v53 = vpop.f32.mrb[3].mxu1  ;;  %v1681_v16 = vpop.f32.mrb[67].mxu0  ;;  %2023 = vmatprep.subr.bf16.mxu1 %v3520_v1 }
 0x24a   :  { %v1733_v39 = vcombine.high %v1732_v35, %v1732_v35  ;;  %v1806_v20 = vrot.slane %v1799_v51, %v3708_v5 }
 0x24c   :  { %v1740_v29 = vrot.slane %v1733_v39, %v3708_v5  ;;  %2024 = vmatpush1.bf16.msra.mxu1 %v3531_v7  ;;  %v1788_v7 = vrot.slane %v1781_v23, %v3708_v5 }
 0x24d   :  { %2025 = vmatprep.subr.bf16.mxu1 %v3534_v9 }
 0x24e   :  { %v1742_v32 = vadd.f32 %v1740_v29, %v1724_v24 }
 0x250   :  { %2026 = vmatpush1.bf16.msra.mxu1 %v3545_v17 }
 0x251   :  { %2027 = vmatprep.subr.bf16.mxu1 %v3548_v45 }
 0x254   :  { %2028 = vmatpush1.bf16.msra.mxu1 %v3869_v25 }
 0x255   :  { %2029 = vmatprep.subr.bf16.mxu1 %v3870_v42 }
 0x258   :  { %2030 = vmatpush1.bf16.msra.mxu1 %v3871_v28 }
 0x259   :  { %2031 = vmatprep.subr.bf16.mxu1 %v3872_v58 }
 0x25c   :  { %2032 = vmatpush1.bf16.msra.mxu1 %v3873_v3 }
 0x25d   :  { %2033 = vmatprep.subr.bf16.mxu1 %v3874_v10 }
 0x260   :  { %2034 = vmatpush1.bf16.msra.mxu1 %v3875_v37 }
 0x261   :  { %2035 = vmatprep.subr.bf16.mxu1 %v3876_v26 }
 0x264   :  { %2036 = vmatpush1.bf16.msra.mxu1 %v3877_v59 }
 0x265   :  { %2037 = vmatprep.subr.bf16.mxu1 %v3878_v47 }
 0x268   :  { %2038 = vmatpush1.bf16.msra.mxu1 %v3629_v14 }
 0x269   :  { %2039 = vmatprep.subr.bf16.mxu1 %v3632_v21  ;;  %v1795_v21 = vrot.slane %v1788_v7, %v3708_v5 }
 0x26c   :  { %2040 = vmatpush1.bf16.msra.mxu1 %v3643_v38 }
 0x26d   :  { %2041 = vmatprep.subr.bf16.mxu1 %v3646_v34 }
 0x270   :  { %2042 = vmatpush1.bf16.msra.mxu1 %v3651_v15  ;;  %v1807_v15 = vcombine.high %v1806_v20, %v1806_v20 }
 0x272   :  { %v1814_v34 = vrot.slane %v1807_v15, %v3708_v5 }
 0x273   :  { %2044 = vmatmul.mubr.bf16.vlgmr.msra.gmra.mrb[16].mxu1 %v3454_v40 }
 0x286   :  { %v1635_v12 = vpop.f32.mrb[4].mxu1 }
 0x287   :  { %v1750_v18 = vrot.slane %v1635_v12, %v3708_v5  ;;  %v1637_v48 = vpop.f32.mrb[5].mxu1 }
 0x288   :  { %v1768_v13 = vrot.slane %v1637_v48, %v3708_v5  ;;  %v1639_v19 = vpop.f32.mrb[6].mxu1  ;;  %v1922_v52 = vpop.f32.mrb[68].mxu0 }
 0x289   :  { %v1757_v41 = vrot.slane %v1750_v18, %v3708_v5  ;;  %v1640_v4 = vpop.f32.mrb[7].mxu1  ;;  %v1924_v50 = vpop.f32.mrb[69].mxu0  ;;  %v2052_v17 = vadd.f32 %v1922_v52, %v887_v8 }
 0x28a   :  { %v1769_v55 = vcombine.high %v1768_v13, %v1768_v13  ;;  %v2060_v57 = vrot.slane %v1924_v50, %v3708_v5  ;;  %v1926_v40 = vpop.f32.mrb[70].mxu0 }
 0x28b   :  { %v1758_v63 = vcombine.high %v1757_v41, %v1757_v41  ;;  %v1927_v1 = vpop.f32.mrb[71].mxu0 }
 0x28c   :  { %v1776_v9 = vrot.slane %v1769_v55, %v3708_v5  ;;  %v2061_v45 = vcombine.high %v2060_v57, %v2060_v57 }
 0x28d   :  { %v1760_v22 = vadd.f32 %v1758_v63, %v1742_v32 }
 0x28e   :  { %v1777_v44 = vcombine.high %v1776_v9, %v1776_v9  ;;  %v2068_v14 = vrot.slane %v2061_v45, %v3708_v5 }
 0x290   :  { %v1779_v36 = vadd.f32 %v1777_v44, %v1760_v22  ;;  %v2070_v38 = vadd.f32 %v2068_v14, %v2052_v17  ;;  %v2187_v14 = vsub.s32 0, %v3703_v11 }
 0x292   :  { %v1797_v30 = vadd.f32 %v1795_v21, %v1779_v36 }
 0x294   :  { %v1816_v2 = vadd.f32 %v1814_v34, %v1797_v30 }
 0x2c6   :  { %v1717_v54 = vpop.f32.mrb[8].mxu1 }
 0x2c7   :  { %v1818_v62 = vcombine.high %v1717_v54, %v1717_v54  ;;  %v1719_v6 = vpop.f32.mrb[9].mxu1 }
 0x2c8   :  { %v1837_v60 = vcombine.high %v1719_v6, %v1719_v6  ;;  %v1721_v27 = vpop.f32.mrb[10].mxu1  ;;  %v2004_v61 = vpop.f32.mrb[72].mxu0 }
 0x2c9   :  { %v1825_v33 = vrot.slane %v1818_v62, %v3708_v5  ;;  %v1722_v31 = vpop.f32.mrb[11].mxu1  ;;  %v2006_v46 = vpop.f32.mrb[73].mxu0  ;;  %v2109_v28 = vcombine.high %v2004_v61, %v2004_v61 }
 0x2ca   :  { %v1844_v49 = vrot.slane %v1837_v60, %v3708_v5  ;;  %v2008_v56 = vpop.f32.mrb[74].mxu0  ;;  %v2127_v29 = vcombine.high %v2006_v46, %v2006_v46 }
 0x2cb   :  { %v1832_v35 = vrot.slane %v1825_v33, %v3708_v5  ;;  %v2009_v0 = vpop.f32.mrb[75].mxu0  ;;  %v2116_v51 = vrot.slane %v2109_v28, %v3708_v5 }
 0x2cc   :  { %v1845_v43 = vcombine.high %v1844_v49, %v1844_v49  ;;  %v2134_v26 = vrot.slane %v2127_v29, %v3708_v5 }
 0x2cd   :  { %v1833_v8 = vcombine.high %v1832_v35, %v1832_v35  ;;  %v2123_v13 = vrot.slane %v2116_v51, %v3708_v5 }
 0x2ce   :  { %v1852_v53 = vrot.slane %v1845_v43, %v3708_v5  ;;  %v2135_v48 = vcombine.high %v2134_v26, %v2134_v26 }
 0x2cf   :  { %v1835_v16 = vadd.f32 %v1833_v8, %v1816_v2 }
 0x2d0   :  { %v1853_v39 = vcombine.high %v1852_v53, %v1852_v53  ;;  %v2142_v52 = vrot.slane %v2135_v48, %v3708_v5 }
 0x2d2   :  { %v1855_v24 = vadd.f32 %v1853_v39, %v1835_v16 }
 0x306   :  { %v1963_v32 = vpop.f32.mrb[12].mxu1 }
 0x307   :  { %v2078_v25 = vrot.slane %v1963_v32, %v3708_v5  ;;  %v1965_v42 = vpop.f32.mrb[13].mxu1 }
 0x308   :  { %v2096_v58 = vrot.slane %v1965_v42, %v3708_v5  ;;  %v1967_v3 = vpop.f32.mrb[14].mxu1 }
 0x309   :  { %v2085_v10 = vrot.slane %v2078_v25, %v3708_v5  ;;  %v1968_v37 = vpop.f32.mrb[15].mxu1 }
 0x30a   :  { %v2097_v59 = vcombine.high %v2096_v58, %v2096_v58 }
 0x30b   :  { %v2086_v47 = vcombine.high %v2085_v10, %v2085_v10 }
 0x30c   :  { %v2104_v12 = vrot.slane %v2097_v59, %v3708_v5 }
 0x30d   :  { %v2088_v18 = vadd.f32 %v2086_v47, %v2070_v38 }
 0x30e   :  { %v2105_v23 = vcombine.high %v2104_v12, %v2104_v12 }
 0x310   :  { %v2107_v19 = vadd.f32 %v2105_v23, %v2088_v18 }
 0x312   :  { %v2125_v41 = vadd.f32 %v2123_v13, %v2107_v19 }
 0x314   :  { %v2144_v4 = vadd.f32 %v2142_v52, %v2125_v41 }
 0x346   :  { %v2045_v50 = vpop.f32.mrb[16].mxu1 }
 0x347   :  { %v2146_v20 = vcombine.high %v2045_v50, %v2045_v50  ;;  %v2047_v55 = vpop.f32.mrb[17].mxu1 }
 0x348   :  { %v2165_v57 = vcombine.high %v2047_v55, %v2047_v55  ;;  %v2049_v40 = vpop.f32.mrb[18].mxu1 }
 0x349   :  { %v2153_v63 = vrot.slane %v2146_v20, %v3708_v5  ;;  %v2050_v1 = vpop.f32.mrb[19].mxu1 }
 0x34a   :  { %v2172_v7 = vrot.slane %v2165_v57, %v3708_v5 }
 0x34b   :  { %v2160_v9 = vrot.slane %v2153_v63, %v3708_v5 }
 0x34c   :  { %v2173_v17 = vcombine.high %v2172_v7, %v2172_v7 }
 0x34d   :  { %v2161_v45 = vcombine.high %v2160_v9, %v2160_v9 }
 0x34e   :  { %v2180_v22 = vrot.slane %v2173_v17, %v3708_v5 }
 0x34f   :  { %v2163_v15 = vadd.f32 %v2161_v45, %v2144_v4 }
 0x350   :  { %v2181_v44 = vcombine.high %v2180_v22, %v2180_v22 }
 0x352   :  { %v2183_v21 = vadd.f32 %v2181_v44, %v2163_v15 }
 0x354   :  { %v2188_v36 = vrot.slane %v2183_v21, %v2187_v14 }
 0x356   :  { %v2191_v38 = vsel %vm2190_vm2, %v1855_v24, %v2188_v36 }
 0x357   :  { %2192 = vst [vmem:[#allocation2] sm:$0x3] %v2191_v38 }
 0x358   :  { %2557 = shalt.err (!%p2554_p4)
}
 0x359   :  { %s2558_s24 = scalar_lea.hbm %s3782_s5, 32 }
 0x35a   :  { %p2559_p5 = scmp.ne.s32.totalorder %s3782_s5, %s2558_s24  ;;  %p2562_p6 = scmp.lt.u32.totalorder %s2558_s24, %s3782_s5 }
 0x35c   :  { %p2564_p7 = pnand %p2562_p6, %p2559_p5 }
 0x35e   :  { %2567 = shalt.err (!%p2564_p7)
}
 0x35f   :  { %2202 = dma.vmem_to_hbm [thread:$0]  %s2200_s20, 32, %s3782_s5, [#allocation3]  }
 0x360   :  { %2568 = dma.done.wait [#allocation3], 32  }
 0x361   :  { %2569 = vsyncadd [#allocation3], 4294967264 }
 0x362   :  { %2206 = vsyncpa [#allocation3], 1 }

</bundles_post_ra>
